<compile_context>
chip_gen: v5e
topology: v5e:2x2
jax: 0.10.0
libtpu: 0.0.40
codegen_flags: <defaults>
</compile_context>

<pallas_src>
import functools
import math

import numpy as np
import jax
import jax.numpy as jnp
from jax import lax
from jax.experimental import pallas as pl
from jax.experimental.pallas import tpu as pltpu

EPS = 1e-6


def _layernorm(x, alpha, bias, eps=EPS):
    # matches torch Normalize: alpha * (x - mean) / (std_unbiased + eps) + bias
    mu = jnp.mean(x, axis=-1, keepdims=True)
    xc = x - mu
    var = jnp.sum(xc * xc, axis=-1, keepdims=True) * (1.0 / (x.shape[-1] - 1))
    inv = pl.reciprocal(jnp.sqrt(var) + eps, approx=True)   # EUP slot, ~free
    return alpha * (xc * inv) + bias


def encoder_kernel(x_ref, mbias_ref,
                   a1_ref, b1_ref, wq_ref, wk_ref, wv_ref, wo_ref, bo_ref,
                   a2_ref, b2_ref, w1_ref, bf1_ref, w2_ref, bf2_ref,
                   af_ref, bfin_ref,
                   o_ref, x_acc,
                   *, heads):
    l = pl.program_id(1)
    num_layers = pl.num_programs(1)

    S, E = x_acc.shape
    Dh = E // heads
    scale = 1.0 / math.sqrt(Dh)

    # carry activations across the layer grid axis in VMEM scratch
    @pl.when(l == 0)
    def _():
        x_acc[...] = x_ref[0]

    x = x_acc[...]                  # (S, E) float32
    mbias = mbias_ref[0]            # (1, S): 0.0 where valid, -1e9 where masked

    # ---------------- self-attention sub-block ----------------
    xn = _layernorm(x, a1_ref[0], b1_ref[0])
    xn16 = xn.astype(jnp.bfloat16)
    # fold 1/sqrt(Dh) into q: one (S,E) multiply instead of heads x (S,S)
    q = jnp.dot(xn16, wq_ref[0], preferred_element_type=jnp.float32) * scale
    k = jnp.dot(xn16, wk_ref[0], preferred_element_type=jnp.float32)
    v = jnp.dot(xn16, wv_ref[0], preferred_element_type=jnp.float32)
    q16 = q.astype(jnp.bfloat16)
    k16 = k.astype(jnp.bfloat16)
    v16 = v.astype(jnp.bfloat16)
    wo16 = wo_ref[0]                # (E, E) bf16

    # TODO(synk): for long sequences, tile the key axis with an online-softmax
    # (flash-style) loop instead of materializing the full (S, S) score matrix.
    attn = jnp.zeros((S, E), jnp.float32)
    for h in range(heads):
        sl = slice(h * Dh, (h + 1) * Dh)
        # contract last dims of q and k directly (no explicit transpose)
        s = lax.dot_general(q16[:, sl], k16[:, sl],
                            (((1,), (1,)), ((), ())),
                            preferred_element_type=jnp.float32)
        s = s + mbias                                   # hoisted additive mask
        s = s - jnp.max(s, axis=-1, keepdims=True)
        p = jnp.exp(s)
        p = p * pl.reciprocal(jnp.sum(p, axis=-1, keepdims=True), approx=True)
        # attention dropout: identity in eval mode
        ctx = jnp.dot(p.astype(jnp.bfloat16), v16[:, sl],
                      preferred_element_type=jnp.float32)
        # accumulate through the matching Wo rows (no head concat / relayout)
        attn = attn + jnp.dot(ctx.astype(jnp.bfloat16), wo16[sl, :],
                              preferred_element_type=jnp.float32)
    x = x + attn + bo_ref[0]        # residual (dropout = identity)

    # ---------------- feed-forward sub-block ----------------
    xn = _layernorm(x, a2_ref[0], b2_ref[0])
    hid = jnp.dot(xn.astype(jnp.bfloat16), w1_ref[0],
                  preferred_element_type=jnp.float32) + bf1_ref[0]
    hid = jnp.maximum(hid, 0.0)     # ReLU (dropout = identity)
    ff = jnp.dot(hid.astype(jnp.bfloat16), w2_ref[0],
                 preferred_element_type=jnp.float32) + bf2_ref[0]
    x = x + ff                      # residual (dropout = identity)

    x_acc[...] = x

    @pl.when(l == num_layers - 1)
    def _():
        o_ref[0] = _layernorm(x, af_ref[0], bfin_ref[0])


def make_pos_encoder(E, max_seq):
    pe = np.zeros((max_seq, E), np.float32)
    for pos in range(max_seq):
        for i in range(0, E, 2):
            pe[pos, i] = math.sin(pos / 10000 ** (2 * i / E))
            if i + 1 < E:
                pe[pos, i + 1] = math.cos(pos / 10000 ** (2 * (i + 1) / E))
    return jnp.asarray(pe)


def init_params(key, vocab, E, max_seq, blocks, heads, hidden=2048):
    L = blocks
    ks = jax.random.split(key, 10)

    def rnd(k, shape, scale=0.05):
        return (scale * jax.random.normal(k, shape)).astype(jnp.float32)

    return {
        "embedding": jax.random.normal(ks[0], (vocab, E), jnp.float32),
        "pos_encoder": make_pos_encoder(E, max_seq),
        "a1": jnp.ones((L, 1, E), jnp.float32),
        "b1": jnp.zeros((L, 1, E), jnp.float32),
        "wq": rnd(ks[1], (L, E, E)),
        "wk": rnd(ks[2], (L, E, E)),
        "wv": rnd(ks[3], (L, E, E)),
        "wo": rnd(ks[4], (L, E, E)),
        "bo": rnd(ks[5], (L, 1, E)),
        "a2": jnp.ones((L, 1, E), jnp.float32),
        "b2": jnp.zeros((L, 1, E), jnp.float32),
        "w1": rnd(ks[6], (L, E, hidden)),
        "bf1": rnd(ks[7], (L, 1, hidden)),
        "w2": rnd(ks[8], (L, hidden, E)),
        "bf2": rnd(ks[9], (L, 1, E)),
        "af": jnp.ones((1, 1, E), jnp.float32),
        "bf": jnp.zeros((1, 1, E), jnp.float32),
    }


def embed_and_pos(tokens, params):
    # plain-JAX glue: embedding gather + positional encoding
    emb = params["embedding"][tokens]                 # (B, S, E)
    S, E = emb.shape[1], emb.shape[2]
    return emb * math.sqrt(E) + params["pos_encoder"][None, :S, :]


def encoder_forward(tokens, mask, params, *, blocks, heads):
    x = embed_and_pos(tokens, params).astype(jnp.float32)   # (B, S, E)
    B, S, E = x.shape
    L = blocks
    Hid = params["w1"].shape[-1]

    # additive mask bias computed once host-side (hoisted out of layer/head loops)
    mask_bias = jnp.where(mask.astype(jnp.float32) == 0.0,
                          jnp.float32(-1e9), jnp.float32(0.0))   # (B, 1, S)

    # bf16 weights: halves weight DMA / VMEM residency, bf16 MXU path on v6e/v7x
    to_bf16 = lambda a: a.astype(jnp.bfloat16)
    wq, wk, wv, wo = map(to_bf16, (params["wq"], params["wk"],
                                   params["wv"], params["wo"]))
    w1, w2 = to_bf16(params["w1"]), to_bf16(params["w2"])

    kernel = functools.partial(encoder_kernel, heads=heads)

    def per_batch(shape):
        nd = len(shape)
        return pl.BlockSpec((1,) + shape[1:], lambda b, l: (b,) + (0,) * (nd - 1))

    def per_layer(shape):
        nd = len(shape)
        return pl.BlockSpec((1,) + shape[1:], lambda b, l: (l,) + (0,) * (nd - 1))

    def shared(shape):
        nd = len(shape)
        return pl.BlockSpec(shape, lambda b, l: (0,) * nd)

    # advisory cost hint for the XLA scheduler
    flops = 2 * B * L * (4 * S * E * E + 2 * S * S * E + 2 * S * E * Hid)
    transcendentals = B * L * heads * S * S
    bytes_accessed = (2 * L * (4 * E * E + 2 * E * Hid)      # bf16 weights
                      + 2 * B * S * E * 4 + B * S * 4         # activations + mask
                      + 4 * L * (6 * E + Hid) + 8 * E)        # small f32 params

    out = pl.pallas_call(
        kernel,
        out_shape=jax.ShapeDtypeStruct((B, S, E), jnp.float32),
        grid_spec=pltpu.PrefetchScalarGridSpec(
            num_scalar_prefetch=0,
            grid=(B, L),                      # layer axis innermost, sequential
            in_specs=[
                per_batch((B, S, E)),         # x (fetched once per batch item)
                per_batch((B, 1, S)),         # mask bias
                per_layer((L, 1, E)),         # a1
                per_layer((L, 1, E)),         # b1
                per_layer((L, E, E)),         # wq
                per_layer((L, E, E)),         # wk
                per_layer((L, E, E)),         # wv
                per_layer((L, E, E)),         # wo
                per_layer((L, 1, E)),         # bo
                per_layer((L, 1, E)),         # a2
                per_layer((L, 1, E)),         # b2
                per_layer((L, E, Hid)),       # w1
                per_layer((L, 1, Hid)),       # bf1
                per_layer((L, Hid, E)),       # w2
                per_layer((L, 1, E)),         # bf2
                shared((1, 1, E)),            # af (final LN scale)
                shared((1, 1, E)),            # bf (final LN bias)
            ],
            out_specs=pl.BlockSpec((1, S, E), lambda b, l: (b, 0, 0)),
            scratch_shapes=[pltpu.VMEM((S, E), jnp.float32)],   # activation carry
        ),
        compiler_params=pltpu.CompilerParams(
            dimension_semantics=("parallel", "arbitrary"),
            # per-layer weights (double-buffered) must fit; bounded for v7x's 64 MiB
            vmem_limit_bytes=48 * 1024 * 1024,
        ),
        cost_estimate=pl.CostEstimate(
            flops=int(flops),
            transcendentals=int(transcendentals),
            bytes_accessed=int(bytes_accessed),
        ),
    )(x, mask_bias,
      params["a1"], params["b1"], wq, wk, wv, wo, params["bo"],
      params["a2"], params["b2"], w1, params["bf1"], w2, params["bf2"],
      params["af"], params["bf"])
    return out


def ref_forward(tokens, mask, params, *, blocks, heads):
    # pure-JAX f32 reference mirroring the PyTorch forward (dropout = identity)
    x = embed_and_pos(tokens, params)
    B, S, E = x.shape
    Dh = E // heads
    mask = mask.astype(jnp.float32)
    hp = jax.lax.Precision.HIGHEST

    def ln(x, a, b):
        mu = x.mean(-1, keepdims=True)
        xc = x - mu
        std = jnp.sqrt((xc * xc).sum(-1, keepdims=True) / (E - 1))
        return a * xc / (std + EPS) + b

    for l in range(blocks):
        xn = ln(x, params["a1"][l, 0], params["b1"][l, 0])
        q = jnp.einsum("bse,ef->bsf", xn, params["wq"][l], precision=hp)
        k = jnp.einsum("bse,ef->bsf", xn, params["wk"][l], precision=hp)
        v = jnp.einsum("bse,ef->bsf", xn, params["wv"][l], precision=hp)
        q = q.reshape(B, S, heads, Dh).transpose(0, 2, 1, 3)
        k = k.reshape(B, S, heads, Dh).transpose(0, 2, 1, 3)
        v = v.reshape(B, S, heads, Dh).transpose(0, 2, 1, 3)
        s = jnp.einsum("bhqd,bhkd->bhqk", q, k, precision=hp) / math.sqrt(Dh)
        s = jnp.where(mask[:, None] == 0.0, -1e9, s)
        p = jax.nn.softmax(s, axis=-1)
        o = jnp.einsum("bhqk,bhkd->bhqd", p, v, precision=hp)
        o = o.transpose(0, 2, 1, 3).reshape(B, S, E)
        o = jnp.einsum("bse,ef->bsf", o, params["wo"][l], precision=hp) + params["bo"][l, 0]
        x = x + o
        xn = ln(x, params["a2"][l, 0], params["b2"][l, 0])
        h = jnp.maximum(jnp.einsum("bse,eh->bsh", xn, params["w1"][l], precision=hp)
                        + params["bf1"][l, 0], 0.0)
        f = jnp.einsum("bsh,he->bse", h, params["w2"][l], precision=hp) + params["bf2"][l, 0]
        x = x + f
    return ln(x, params["af"][0, 0], params["bf"][0, 0])


if __name__ == "__main__":
    vocab_size, embedding_size, max_seq_len, blocks, heads = 50, 48, 16, 2, 6
    B, S = 2, 8

    key = jax.random.PRNGKey(0)
    k_param, k_tok = jax.random.split(key)
    params = init_params(k_param, vocab_size, embedding_size, max_seq_len, blocks, heads)

    tokens = jax.random.randint(k_tok, (B, S), 0, vocab_size, dtype=jnp.int32)
    lengths = jnp.array([S, 5])
    mask = (jnp.arange(S)[None, :] < lengths[:, None]).astype(jnp.float32)[:, None, :]  # (B,1,S)

    out = encoder_forward(tokens, mask, params, blocks=blocks, heads=heads)
    out = jax.block_until_ready(out)

    ref = ref_forward(tokens, mask, params, blocks=blocks, heads=heads)
    np.testing.assert_allclose(np.asarray(out), np.asarray(ref), rtol=5e-2, atol=5e-2)

    print("KERNEL_OK")
</pallas_src>

<mosaic_0001>
module attributes {stable_mosaic.version = 11 : i64} {
  func.func @encoder_kernel(%arg0: i32, %arg1: i32, %arg2: memref<1x8x48xf32, #tpu.memory_space<vmem>>, %arg3: memref<1x1x8xf32, #tpu.memory_space<vmem>>, %arg4: memref<1x1x48xf32, #tpu.memory_space<vmem>>, %arg5: memref<1x1x48xf32, #tpu.memory_space<vmem>>, %arg6: memref<1x48x48xbf16, #tpu.memory_space<vmem>>, %arg7: memref<1x48x48xbf16, #tpu.memory_space<vmem>>, %arg8: memref<1x48x48xbf16, #tpu.memory_space<vmem>>, %arg9: memref<1x48x48xbf16, #tpu.memory_space<vmem>>, %arg10: memref<1x1x48xf32, #tpu.memory_space<vmem>>, %arg11: memref<1x1x48xf32, #tpu.memory_space<vmem>>, %arg12: memref<1x1x48xf32, #tpu.memory_space<vmem>>, %arg13: memref<1x48x2048xbf16, #tpu.memory_space<vmem>>, %arg14: memref<1x1x2048xf32, #tpu.memory_space<vmem>>, %arg15: memref<1x2048x48xbf16, #tpu.memory_space<vmem>>, %arg16: memref<1x1x48xf32, #tpu.memory_space<vmem>>, %arg17: memref<1x1x48xf32, #tpu.memory_space<vmem>>, %arg18: memref<1x1x48xf32, #tpu.memory_space<vmem>>, %arg19: memref<1x8x48xf32, #tpu.memory_space<vmem>>, %arg20: memref<8x48xf32, #tpu.memory_space<vmem>>) attributes {dimension_semantics = [#tpu.dimension_semantics<parallel>, #tpu.dimension_semantics<arbitrary>], iteration_bounds = array<i64: 2, 2>, scalar_prefetch = 0 : i64, scratch_operands = 1 : i64, tpu.core_type = #tpu.core_type<tc>, window_params = [{transform_indices = @transform_0, window_bounds = array<i64: 1, 8, 48>}, {transform_indices = @transform_1, window_bounds = array<i64: 1, 1, 8>}, {transform_indices = @transform_2, window_bounds = array<i64: 1, 1, 48>}, {transform_indices = @transform_3, window_bounds = array<i64: 1, 1, 48>}, {transform_indices = @transform_4, window_bounds = array<i64: 1, 48, 48>}, {transform_indices = @transform_5, window_bounds = array<i64: 1, 48, 48>}, {transform_indices = @transform_6, window_bounds = array<i64: 1, 48, 48>}, {transform_indices = @transform_7, window_bounds = array<i64: 1, 48, 48>}, {transform_indices = @transform_8, window_bounds = array<i64: 1, 1, 48>}, {transform_indices = @transform_9, window_bounds = array<i64: 1, 1, 48>}, {transform_indices = @transform_10, window_bounds = array<i64: 1, 1, 48>}, {transform_indices = @transform_11, window_bounds = array<i64: 1, 48, 2048>}, {transform_indices = @transform_12, window_bounds = array<i64: 1, 1, 2048>}, {transform_indices = @transform_13, window_bounds = array<i64: 1, 2048, 48>}, {transform_indices = @transform_14, window_bounds = array<i64: 1, 1, 48>}, {pipeline_mode = #tpu.pipeline_mode<synchronous>, transform_indices = @transform_15, window_bounds = array<i64: 1, 1, 48>}, {pipeline_mode = #tpu.pipeline_mode<synchronous>, transform_indices = @transform_16, window_bounds = array<i64: 1, 1, 48>}, {transform_indices = @transform_17, window_bounds = array<i64: 1, 8, 48>}]} {
    %c0_i32 = arith.constant 0 : i32
    %0 = arith.cmpi eq, %arg1, %c0_i32 : i32
    %1 = arith.extui %0 : i1 to i32
    %c0_i32_0 = arith.constant 0 : i32
    %2 = arith.cmpi ne, %1, %c0_i32_0 : i32
    scf.if %2 {
      %c0_94 = arith.constant 0 : index
      %c0_95 = arith.constant 0 : index
      %c0_96 = arith.constant 0 : index
      %234 = vector.load %arg2[%c0_94, %c0_95, %c0_96] : memref<1x8x48xf32, #tpu.memory_space<vmem>>, vector<1x8x48xf32>
      %235 = vector.shape_cast %234 : vector<1x8x48xf32> to vector<8x48xf32>
      %c0_97 = arith.constant 0 : index
      %c0_98 = arith.constant 0 : index
      %236 = vector.load %arg20[%c0_97, %c0_98] : memref<8x48xf32, #tpu.memory_space<vmem>>, vector<8x48xf32>
      tpu.vector_store %arg20[%c0_97, %c0_98], %235 {strides = array<i32>} : memref<8x48xf32, #tpu.memory_space<vmem>>, vector<8x48xf32>,
    } else {
    }
    %c0 = arith.constant 0 : index
    %c0_1 = arith.constant 0 : index
    %3 = vector.load %arg20[%c0, %c0_1] : memref<8x48xf32, #tpu.memory_space<vmem>>, vector<8x48xf32>
    %c0_2 = arith.constant 0 : index
    %c0_3 = arith.constant 0 : index
    %c0_4 = arith.constant 0 : index
    %4 = vector.load %arg3[%c0_2, %c0_3, %c0_4] : memref<1x1x8xf32, #tpu.memory_space<vmem>>, vector<1x1x8xf32>
    %5 = vector.shape_cast %4 : vector<1x1x8xf32> to vector<1x8xf32>
    %c0_5 = arith.constant 0 : index
    %c0_6 = arith.constant 0 : index
    %c0_7 = arith.constant 0 : index
    %6 = vector.load %arg4[%c0_5, %c0_6, %c0_7] : memref<1x1x48xf32, #tpu.memory_space<vmem>>, vector<1x1x48xf32>
    %7 = vector.shape_cast %6 : vector<1x1x48xf32> to vector<1x48xf32>
    %c0_8 = arith.constant 0 : index
    %c0_9 = arith.constant 0 : index
    %c0_10 = arith.constant 0 : index
    %8 = vector.load %arg5[%c0_8, %c0_9, %c0_10] : memref<1x1x48xf32, #tpu.memory_space<vmem>>, vector<1x1x48xf32>
    %9 = vector.shape_cast %8 : vector<1x1x48xf32> to vector<1x48xf32>
    %cst = arith.constant dense<0.000000e+00> : vector<8xf32>
    %10 = vector.multi_reduction <add>, %3, %cst [1] : vector<8x48xf32> to vector<8xf32>
    %11 = vector.shape_cast %10 : vector<8xf32> to vector<8x1xf32>
    %cst_11 = arith.constant 4.800000e+01 : f32
    %12 = vector.broadcast %cst_11 : f32 to vector<8x1xf32>
    %13 = arith.divf %11, %12 : vector<8x1xf32>
    %14 = vector.broadcast %13 : vector<8x1xf32> to vector<8x48xf32>
    %15 = arith.subf %3, %14 : vector<8x48xf32>
    %16 = arith.mulf %15, %15 : vector<8x48xf32>
    %cst_12 = arith.constant dense<0.000000e+00> : vector<8xf32>
    %17 = vector.multi_reduction <add>, %16, %cst_12 [1] : vector<8x48xf32> to vector<8xf32>
    %18 = vector.shape_cast %17 : vector<8xf32> to vector<8x1xf32>
    %cst_13 = arith.constant 0.0212765951 : f32
    %19 = vector.broadcast %cst_13 : f32 to vector<8x1xf32>
    %20 = arith.mulf %18, %19 : vector<8x1xf32>
    %21 = math.sqrt %20 : vector<8x1xf32>
    %cst_14 = arith.constant 9.99999997E-7 : f32
    %22 = vector.broadcast %cst_14 : f32 to vector<8x1xf32>
    %23 = arith.addf %21, %22 : vector<8x1xf32>
    %24 = tpu.reciprocal %23 {approx = true} : vector<8x1xf32> -> vector<8x1xf32>
    %25 = vector.broadcast %24 : vector<8x1xf32> to vector<8x48xf32>
    %26 = arith.mulf %15, %25 : vector<8x48xf32>
    %27 = vector.broadcast %7 : vector<1x48xf32> to vector<8x48xf32>
    %28 = arith.mulf %27, %26 : vector<8x48xf32>
    %29 = vector.broadcast %9 : vector<1x48xf32> to vector<8x48xf32>
    %30 = arith.addf %28, %29 : vector<8x48xf32>
    %31 = arith.truncf %30 : vector<8x48xf32> to vector<8x48xbf16>
    %c0_15 = arith.constant 0 : index
    %c0_16 = arith.constant 0 : index
    %c0_17 = arith.constant 0 : index
    %32 = vector.load %arg6[%c0_15, %c0_16, %c0_17] : memref<1x48x48xbf16, #tpu.memory_space<vmem>>, vector<1x48x48xbf16>
    %33 = vector.shape_cast %32 : vector<1x48x48xbf16> to vector<48x48xbf16>
    %cst_18 = arith.constant dense<0.000000e+00> : vector<8x48xf32>
    %34 = tpu.matmul %31, %33, %cst_18 {dimension_numbers = #tpu.dot_dimension_numbers<[1], [0], [0], [1], [0, 0, 1, 1], [], []>} : vector<8x48xbf16>, vector<48x48xbf16>, vector<8x48xf32> -> vector<8x48xf32>
    %cst_19 = arith.constant 0.353553385 : f32
    %35 = vector.broadcast %cst_19 : f32 to vector<8x48xf32>
    %36 = arith.mulf %34, %35 : vector<8x48xf32>
    %c0_20 = arith.constant 0 : index
    %c0_21 = arith.constant 0 : index
    %c0_22 = arith.constant 0 : index
    %37 = vector.load %arg7[%c0_20, %c0_21, %c0_22] : memref<1x48x48xbf16, #tpu.memory_space<vmem>>, vector<1x48x48xbf16>
    %38 = vector.shape_cast %37 : vector<1x48x48xbf16> to vector<48x48xbf16>
    %cst_23 = arith.constant dense<0.000000e+00> : vector<8x48xf32>
    %39 = tpu.matmul %31, %38, %cst_23 {dimension_numbers = #tpu.dot_dimension_numbers<[1], [0], [0], [1], [0, 0, 1, 1], [], []>} : vector<8x48xbf16>, vector<48x48xbf16>, vector<8x48xf32> -> vector<8x48xf32>
    %c0_24 = arith.constant 0 : index
    %c0_25 = arith.constant 0 : index
    %c0_26 = arith.constant 0 : index
    %40 = vector.load %arg8[%c0_24, %c0_25, %c0_26] : memref<1x48x48xbf16, #tpu.memory_space<vmem>>, vector<1x48x48xbf16>
    %41 = vector.shape_cast %40 : vector<1x48x48xbf16> to vector<48x48xbf16>
    %cst_27 = arith.constant dense<0.000000e+00> : vector<8x48xf32>
    %42 = tpu.matmul %31, %41, %cst_27 {dimension_numbers = #tpu.dot_dimension_numbers<[1], [0], [0], [1], [0, 0, 1, 1], [], []>} : vector<8x48xbf16>, vector<48x48xbf16>, vector<8x48xf32> -> vector<8x48xf32>
    %43 = arith.truncf %36 : vector<8x48xf32> to vector<8x48xbf16>
    %44 = arith.truncf %39 : vector<8x48xf32> to vector<8x48xbf16>
    %45 = arith.truncf %42 : vector<8x48xf32> to vector<8x48xbf16>
    %c0_28 = arith.constant 0 : index
    %c0_29 = arith.constant 0 : index
    %c0_30 = arith.constant 0 : index
    %46 = vector.load %arg9[%c0_28, %c0_29, %c0_30] : memref<1x48x48xbf16, #tpu.memory_space<vmem>>, vector<1x48x48xbf16>
    %47 = vector.shape_cast %46 : vector<1x48x48xbf16> to vector<48x48xbf16>
    %cst_31 = arith.constant 0.000000e+00 : f32
    %48 = vector.broadcast %cst_31 : f32 to vector<8x48xf32>
    %49 = vector.extract_strided_slice %43 {offsets = [0, 0], sizes = [8, 8], strides = [1, 1]} : vector<8x48xbf16> to vector<8x8xbf16>
    %50 = vector.extract_strided_slice %44 {offsets = [0, 0], sizes = [8, 8], strides = [1, 1]} : vector<8x48xbf16> to vector<8x8xbf16>
    %cst_32 = arith.constant dense<0.000000e+00> : vector<8x8xf32>
    %51 = tpu.matmul %49, %50, %cst_32 {dimension_numbers = #tpu.dot_dimension_numbers<[1], [1], [0], [0], [0, 0, 1, 0], [], []>} : vector<8x8xbf16>, vector<8x8xbf16>, vector<8x8xf32> -> vector<8x8xf32>
    %52 = vector.broadcast %5 : vector<1x8xf32> to vector<8x8xf32>
    %53 = arith.addf %51, %52 : vector<8x8xf32>
    %cst_33 = arith.constant dense<0xFF800000> : vector<8xf32>
    %54 = vector.multi_reduction <maximumf>, %53, %cst_33 [1] : vector<8x8xf32> to vector<8xf32>
    %55 = vector.shape_cast %54 : vector<8xf32> to vector<8x1xf32>
    %56 = vector.broadcast %55 : vector<8x1xf32> to vector<8x8xf32>
    %57 = arith.subf %53, %56 : vector<8x8xf32>
    %58 = math.exp %57 : vector<8x8xf32>
    %cst_34 = arith.constant dense<0.000000e+00> : vector<8xf32>
    %59 = vector.multi_reduction <add>, %58, %cst_34 [1] : vector<8x8xf32> to vector<8xf32>
    %60 = vector.shape_cast %59 : vector<8xf32> to vector<8x1xf32>
    %61 = tpu.reciprocal %60 {approx = true} : vector<8x1xf32> -> vector<8x1xf32>
    %62 = vector.broadcast %61 : vector<8x1xf32> to vector<8x8xf32>
    %63 = arith.mulf %58, %62 : vector<8x8xf32>
    %64 = arith.truncf %63 : vector<8x8xf32> to vector<8x8xbf16>
    %65 = vector.extract_strided_slice %45 {offsets = [0, 0], sizes = [8, 8], strides = [1, 1]} : vector<8x48xbf16> to vector<8x8xbf16>
    %cst_35 = arith.constant dense<0.000000e+00> : vector<8x8xf32>
    %66 = tpu.matmul %64, %65, %cst_35 {dimension_numbers = #tpu.dot_dimension_numbers<[1], [0], [0], [1], [0, 0, 1, 1], [], []>} : vector<8x8xbf16>, vector<8x8xbf16>, vector<8x8xf32> -> vector<8x8xf32>
    %67 = arith.truncf %66 : vector<8x8xf32> to vector<8x8xbf16>
    %68 = vector.extract_strided_slice %47 {offsets = [0, 0], sizes = [8, 48], strides = [1, 1]} : vector<48x48xbf16> to vector<8x48xbf16>
    %cst_36 = arith.constant dense<0.000000e+00> : vector<8x48xf32>
    %69 = tpu.matmul %67, %68, %cst_36 {dimension_numbers = #tpu.dot_dimension_numbers<[1], [0], [0], [1], [0, 0, 1, 1], [], []>} : vector<8x8xbf16>, vector<8x48xbf16>, vector<8x48xf32> -> vector<8x48xf32>
    %70 = arith.addf %48, %69 : vector<8x48xf32>
    %71 = vector.extract_strided_slice %43 {offsets = [0, 8], sizes = [8, 8], strides = [1, 1]} : vector<8x48xbf16> to vector<8x8xbf16>
    %72 = vector.extract_strided_slice %44 {offsets = [0, 8], sizes = [8, 8], strides = [1, 1]} : vector<8x48xbf16> to vector<8x8xbf16>
    %cst_37 = arith.constant dense<0.000000e+00> : vector<8x8xf32>
    %73 = tpu.matmul %71, %72, %cst_37 {dimension_numbers = #tpu.dot_dimension_numbers<[1], [1], [0], [0], [0, 0, 1, 0], [], []>} : vector<8x8xbf16>, vector<8x8xbf16>, vector<8x8xf32> -> vector<8x8xf32>
    %74 = vector.broadcast %5 : vector<1x8xf32> to vector<8x8xf32>
    %75 = arith.addf %73, %74 : vector<8x8xf32>
    %cst_38 = arith.constant dense<0xFF800000> : vector<8xf32>
    %76 = vector.multi_reduction <maximumf>, %75, %cst_38 [1] : vector<8x8xf32> to vector<8xf32>
    %77 = vector.shape_cast %76 : vector<8xf32> to vector<8x1xf32>
    %78 = vector.broadcast %77 : vector<8x1xf32> to vector<8x8xf32>
    %79 = arith.subf %75, %78 : vector<8x8xf32>
    %80 = math.exp %79 : vector<8x8xf32>
    %cst_39 = arith.constant dense<0.000000e+00> : vector<8xf32>
    %81 = vector.multi_reduction <add>, %80, %cst_39 [1] : vector<8x8xf32> to vector<8xf32>
    %82 = vector.shape_cast %81 : vector<8xf32> to vector<8x1xf32>
    %83 = tpu.reciprocal %82 {approx = true} : vector<8x1xf32> -> vector<8x1xf32>
    %84 = vector.broadcast %83 : vector<8x1xf32> to vector<8x8xf32>
    %85 = arith.mulf %80, %84 : vector<8x8xf32>
    %86 = arith.truncf %85 : vector<8x8xf32> to vector<8x8xbf16>
    %87 = vector.extract_strided_slice %45 {offsets = [0, 8], sizes = [8, 8], strides = [1, 1]} : vector<8x48xbf16> to vector<8x8xbf16>
    %cst_40 = arith.constant dense<0.000000e+00> : vector<8x8xf32>
    %88 = tpu.matmul %86, %87, %cst_40 {dimension_numbers = #tpu.dot_dimension_numbers<[1], [0], [0], [1], [0, 0, 1, 1], [], []>} : vector<8x8xbf16>, vector<8x8xbf16>, vector<8x8xf32> -> vector<8x8xf32>
    %89 = arith.truncf %88 : vector<8x8xf32> to vector<8x8xbf16>
    %90 = vector.extract_strided_slice %47 {offsets = [8, 0], sizes = [8, 48], strides = [1, 1]} : vector<48x48xbf16> to vector<8x48xbf16>
    %cst_41 = arith.constant dense<0.000000e+00> : vector<8x48xf32>
    %91 = tpu.matmul %89, %90, %cst_41 {dimension_numbers = #tpu.dot_dimension_numbers<[1], [0], [0], [1], [0, 0, 1, 1], [], []>} : vector<8x8xbf16>, vector<8x48xbf16>, vector<8x48xf32> -> vector<8x48xf32>
    %92 = arith.addf %70, %91 : vector<8x48xf32>
    %93 = vector.extract_strided_slice %43 {offsets = [0, 16], sizes = [8, 8], strides = [1, 1]} : vector<8x48xbf16> to vector<8x8xbf16>
    %94 = vector.extract_strided_slice %44 {offsets = [0, 16], sizes = [8, 8], strides = [1, 1]} : vector<8x48xbf16> to vector<8x8xbf16>
    %cst_42 = arith.constant dense<0.000000e+00> : vector<8x8xf32>
    %95 = tpu.matmul %93, %94, %cst_42 {dimension_numbers = #tpu.dot_dimension_numbers<[1], [1], [0], [0], [0, 0, 1, 0], [], []>} : vector<8x8xbf16>, vector<8x8xbf16>, vector<8x8xf32> -> vector<8x8xf32>
    %96 = vector.broadcast %5 : vector<1x8xf32> to vector<8x8xf32>
    %97 = arith.addf %95, %96 : vector<8x8xf32>
    %cst_43 = arith.constant dense<0xFF800000> : vector<8xf32>
    %98 = vector.multi_reduction <maximumf>, %97, %cst_43 [1] : vector<8x8xf32> to vector<8xf32>
    %99 = vector.shape_cast %98 : vector<8xf32> to vector<8x1xf32>
    %100 = vector.broadcast %99 : vector<8x1xf32> to vector<8x8xf32>
    %101 = arith.subf %97, %100 : vector<8x8xf32>
    %102 = math.exp %101 : vector<8x8xf32>
    %cst_44 = arith.constant dense<0.000000e+00> : vector<8xf32>
    %103 = vector.multi_reduction <add>, %102, %cst_44 [1] : vector<8x8xf32> to vector<8xf32>
    %104 = vector.shape_cast %103 : vector<8xf32> to vector<8x1xf32>
    %105 = tpu.reciprocal %104 {approx = true} : vector<8x1xf32> -> vector<8x1xf32>
    %106 = vector.broadcast %105 : vector<8x1xf32> to vector<8x8xf32>
    %107 = arith.mulf %102, %106 : vector<8x8xf32>
    %108 = arith.truncf %107 : vector<8x8xf32> to vector<8x8xbf16>
    %109 = vector.extract_strided_slice %45 {offsets = [0, 16], sizes = [8, 8], strides = [1, 1]} : vector<8x48xbf16> to vector<8x8xbf16>
    %cst_45 = arith.constant dense<0.000000e+00> : vector<8x8xf32>
    %110 = tpu.matmul %108, %109, %cst_45 {dimension_numbers = #tpu.dot_dimension_numbers<[1], [0], [0], [1], [0, 0, 1, 1], [], []>} : vector<8x8xbf16>, vector<8x8xbf16>, vector<8x8xf32> -> vector<8x8xf32>
    %111 = arith.truncf %110 : vector<8x8xf32> to vector<8x8xbf16>
    %112 = vector.extract_strided_slice %47 {offsets = [16, 0], sizes = [8, 48], strides = [1, 1]} : vector<48x48xbf16> to vector<8x48xbf16>
    %cst_46 = arith.constant dense<0.000000e+00> : vector<8x48xf32>
    %113 = tpu.matmul %111, %112, %cst_46 {dimension_numbers = #tpu.dot_dimension_numbers<[1], [0], [0], [1], [0, 0, 1, 1], [], []>} : vector<8x8xbf16>, vector<8x48xbf16>, vector<8x48xf32> -> vector<8x48xf32>
    %114 = arith.addf %92, %113 : vector<8x48xf32>
    %115 = vector.extract_strided_slice %43 {offsets = [0, 24], sizes = [8, 8], strides = [1, 1]} : vector<8x48xbf16> to vector<8x8xbf16>
    %116 = vector.extract_strided_slice %44 {offsets = [0, 24], sizes = [8, 8], strides = [1, 1]} : vector<8x48xbf16> to vector<8x8xbf16>
    %cst_47 = arith.constant dense<0.000000e+00> : vector<8x8xf32>
    %117 = tpu.matmul %115, %116, %cst_47 {dimension_numbers = #tpu.dot_dimension_numbers<[1], [1], [0], [0], [0, 0, 1, 0], [], []>} : vector<8x8xbf16>, vector<8x8xbf16>, vector<8x8xf32> -> vector<8x8xf32>
    %118 = vector.broadcast %5 : vector<1x8xf32> to vector<8x8xf32>
    %119 = arith.addf %117, %118 : vector<8x8xf32>
    %cst_48 = arith.constant dense<0xFF800000> : vector<8xf32>
    %120 = vector.multi_reduction <maximumf>, %119, %cst_48 [1] : vector<8x8xf32> to vector<8xf32>
    %121 = vector.shape_cast %120 : vector<8xf32> to vector<8x1xf32>
    %122 = vector.broadcast %121 : vector<8x1xf32> to vector<8x8xf32>
    %123 = arith.subf %119, %122 : vector<8x8xf32>
    %124 = math.exp %123 : vector<8x8xf32>
    %cst_49 = arith.constant dense<0.000000e+00> : vector<8xf32>
    %125 = vector.multi_reduction <add>, %124, %cst_49 [1] : vector<8x8xf32> to vector<8xf32>
    %126 = vector.shape_cast %125 : vector<8xf32> to vector<8x1xf32>
    %127 = tpu.reciprocal %126 {approx = true} : vector<8x1xf32> -> vector<8x1xf32>
    %128 = vector.broadcast %127 : vector<8x1xf32> to vector<8x8xf32>
    %129 = arith.mulf %124, %128 : vector<8x8xf32>
    %130 = arith.truncf %129 : vector<8x8xf32> to vector<8x8xbf16>
    %131 = vector.extract_strided_slice %45 {offsets = [0, 24], sizes = [8, 8], strides = [1, 1]} : vector<8x48xbf16> to vector<8x8xbf16>
    %cst_50 = arith.constant dense<0.000000e+00> : vector<8x8xf32>
    %132 = tpu.matmul %130, %131, %cst_50 {dimension_numbers = #tpu.dot_dimension_numbers<[1], [0], [0], [1], [0, 0, 1, 1], [], []>} : vector<8x8xbf16>, vector<8x8xbf16>, vector<8x8xf32> -> vector<8x8xf32>
    %133 = arith.truncf %132 : vector<8x8xf32> to vector<8x8xbf16>
    %134 = vector.extract_strided_slice %47 {offsets = [24, 0], sizes = [8, 48], strides = [1, 1]} : vector<48x48xbf16> to vector<8x48xbf16>
    %cst_51 = arith.constant dense<0.000000e+00> : vector<8x48xf32>
    %135 = tpu.matmul %133, %134, %cst_51 {dimension_numbers = #tpu.dot_dimension_numbers<[1], [0], [0], [1], [0, 0, 1, 1], [], []>} : vector<8x8xbf16>, vector<8x48xbf16>, vector<8x48xf32> -> vector<8x48xf32>
    %136 = arith.addf %114, %135 : vector<8x48xf32>
    %137 = vector.extract_strided_slice %43 {offsets = [0, 32], sizes = [8, 8], strides = [1, 1]} : vector<8x48xbf16> to vector<8x8xbf16>
    %138 = vector.extract_strided_slice %44 {offsets = [0, 32], sizes = [8, 8], strides = [1, 1]} : vector<8x48xbf16> to vector<8x8xbf16>
    %cst_52 = arith.constant dense<0.000000e+00> : vector<8x8xf32>
    %139 = tpu.matmul %137, %138, %cst_52 {dimension_numbers = #tpu.dot_dimension_numbers<[1], [1], [0], [0], [0, 0, 1, 0], [], []>} : vector<8x8xbf16>, vector<8x8xbf16>, vector<8x8xf32> -> vector<8x8xf32>
    %140 = vector.broadcast %5 : vector<1x8xf32> to vector<8x8xf32>
    %141 = arith.addf %139, %140 : vector<8x8xf32>
    %cst_53 = arith.constant dense<0xFF800000> : vector<8xf32>
    %142 = vector.multi_reduction <maximumf>, %141, %cst_53 [1] : vector<8x8xf32> to vector<8xf32>
    %143 = vector.shape_cast %142 : vector<8xf32> to vector<8x1xf32>
    %144 = vector.broadcast %143 : vector<8x1xf32> to vector<8x8xf32>
    %145 = arith.subf %141, %144 : vector<8x8xf32>
    %146 = math.exp %145 : vector<8x8xf32>
    %cst_54 = arith.constant dense<0.000000e+00> : vector<8xf32>
    %147 = vector.multi_reduction <add>, %146, %cst_54 [1] : vector<8x8xf32> to vector<8xf32>
    %148 = vector.shape_cast %147 : vector<8xf32> to vector<8x1xf32>
    %149 = tpu.reciprocal %148 {approx = true} : vector<8x1xf32> -> vector<8x1xf32>
    %150 = vector.broadcast %149 : vector<8x1xf32> to vector<8x8xf32>
    %151 = arith.mulf %146, %150 : vector<8x8xf32>
    %152 = arith.truncf %151 : vector<8x8xf32> to vector<8x8xbf16>
    %153 = vector.extract_strided_slice %45 {offsets = [0, 32], sizes = [8, 8], strides = [1, 1]} : vector<8x48xbf16> to vector<8x8xbf16>
    %cst_55 = arith.constant dense<0.000000e+00> : vector<8x8xf32>
    %154 = tpu.matmul %152, %153, %cst_55 {dimension_numbers = #tpu.dot_dimension_numbers<[1], [0], [0], [1], [0, 0, 1, 1], [], []>} : vector<8x8xbf16>, vector<8x8xbf16>, vector<8x8xf32> -> vector<8x8xf32>
    %155 = arith.truncf %154 : vector<8x8xf32> to vector<8x8xbf16>
    %156 = vector.extract_strided_slice %47 {offsets = [32, 0], sizes = [8, 48], strides = [1, 1]} : vector<48x48xbf16> to vector<8x48xbf16>
    %cst_56 = arith.constant dense<0.000000e+00> : vector<8x48xf32>
    %157 = tpu.matmul %155, %156, %cst_56 {dimension_numbers = #tpu.dot_dimension_numbers<[1], [0], [0], [1], [0, 0, 1, 1], [], []>} : vector<8x8xbf16>, vector<8x48xbf16>, vector<8x48xf32> -> vector<8x48xf32>
    %158 = arith.addf %136, %157 : vector<8x48xf32>
    %159 = vector.extract_strided_slice %43 {offsets = [0, 40], sizes = [8, 8], strides = [1, 1]} : vector<8x48xbf16> to vector<8x8xbf16>
    %160 = vector.extract_strided_slice %44 {offsets = [0, 40], sizes = [8, 8], strides = [1, 1]} : vector<8x48xbf16> to vector<8x8xbf16>
    %cst_57 = arith.constant dense<0.000000e+00> : vector<8x8xf32>
    %161 = tpu.matmul %159, %160, %cst_57 {dimension_numbers = #tpu.dot_dimension_numbers<[1], [1], [0], [0], [0, 0, 1, 0], [], []>} : vector<8x8xbf16>, vector<8x8xbf16>, vector<8x8xf32> -> vector<8x8xf32>
    %162 = vector.broadcast %5 : vector<1x8xf32> to vector<8x8xf32>
    %163 = arith.addf %161, %162 : vector<8x8xf32>
    %cst_58 = arith.constant dense<0xFF800000> : vector<8xf32>
    %164 = vector.multi_reduction <maximumf>, %163, %cst_58 [1] : vector<8x8xf32> to vector<8xf32>
    %165 = vector.shape_cast %164 : vector<8xf32> to vector<8x1xf32>
    %166 = vector.broadcast %165 : vector<8x1xf32> to vector<8x8xf32>
    %167 = arith.subf %163, %166 : vector<8x8xf32>
    %168 = math.exp %167 : vector<8x8xf32>
    %cst_59 = arith.constant dense<0.000000e+00> : vector<8xf32>
    %169 = vector.multi_reduction <add>, %168, %cst_59 [1] : vector<8x8xf32> to vector<8xf32>
    %170 = vector.shape_cast %169 : vector<8xf32> to vector<8x1xf32>
    %171 = tpu.reciprocal %170 {approx = true} : vector<8x1xf32> -> vector<8x1xf32>
    %172 = vector.broadcast %171 : vector<8x1xf32> to vector<8x8xf32>
    %173 = arith.mulf %168, %172 : vector<8x8xf32>
    %174 = arith.truncf %173 : vector<8x8xf32> to vector<8x8xbf16>
    %175 = vector.extract_strided_slice %45 {offsets = [0, 40], sizes = [8, 8], strides = [1, 1]} : vector<8x48xbf16> to vector<8x8xbf16>
    %cst_60 = arith.constant dense<0.000000e+00> : vector<8x8xf32>
    %176 = tpu.matmul %174, %175, %cst_60 {dimension_numbers = #tpu.dot_dimension_numbers<[1], [0], [0], [1], [0, 0, 1, 1], [], []>} : vector<8x8xbf16>, vector<8x8xbf16>, vector<8x8xf32> -> vector<8x8xf32>
    %177 = arith.truncf %176 : vector<8x8xf32> to vector<8x8xbf16>
    %178 = vector.extract_strided_slice %47 {offsets = [40, 0], sizes = [8, 48], strides = [1, 1]} : vector<48x48xbf16> to vector<8x48xbf16>
    %cst_61 = arith.constant dense<0.000000e+00> : vector<8x48xf32>
    %179 = tpu.matmul %177, %178, %cst_61 {dimension_numbers = #tpu.dot_dimension_numbers<[1], [0], [0], [1], [0, 0, 1, 1], [], []>} : vector<8x8xbf16>, vector<8x48xbf16>, vector<8x48xf32> -> vector<8x48xf32>
    %180 = arith.addf %158, %179 : vector<8x48xf32>
    %181 = arith.addf %3, %180 : vector<8x48xf32>
    %c0_62 = arith.constant 0 : index
    %c0_63 = arith.constant 0 : index
    %c0_64 = arith.constant 0 : index
    %182 = vector.load %arg10[%c0_62, %c0_63, %c0_64] : memref<1x1x48xf32, #tpu.memory_space<vmem>>, vector<1x1x48xf32>
    %183 = vector.shape_cast %182 : vector<1x1x48xf32> to vector<1x48xf32>
    %184 = vector.broadcast %183 : vector<1x48xf32> to vector<8x48xf32>
    %185 = arith.addf %181, %184 : vector<8x48xf32>
    %c0_65 = arith.constant 0 : index
    %c0_66 = arith.constant 0 : index
    %c0_67 = arith.constant 0 : index
    %186 = vector.load %arg11[%c0_65, %c0_66, %c0_67] : memref<1x1x48xf32, #tpu.memory_space<vmem>>, vector<1x1x48xf32>
    %187 = vector.shape_cast %186 : vector<1x1x48xf32> to vector<1x48xf32>
    %c0_68 = arith.constant 0 : index
    %c0_69 = arith.constant 0 : index
    %c0_70 = arith.constant 0 : index
    %188 = vector.load %arg12[%c0_68, %c0_69, %c0_70] : memref<1x1x48xf32, #tpu.memory_space<vmem>>, vector<1x1x48xf32>
    %189 = vector.shape_cast %188 : vector<1x1x48xf32> to vector<1x48xf32>
    %cst_71 = arith.constant dense<0.000000e+00> : vector<8xf32>
    %190 = vector.multi_reduction <add>, %185, %cst_71 [1] : vector<8x48xf32> to vector<8xf32>
    %191 = vector.shape_cast %190 : vector<8xf32> to vector<8x1xf32>
    %cst_72 = arith.constant 4.800000e+01 : f32
    %192 = vector.broadcast %cst_72 : f32 to vector<8x1xf32>
    %193 = arith.divf %191, %192 : vector<8x1xf32>
    %194 = vector.broadcast %193 : vector<8x1xf32> to vector<8x48xf32>
    %195 = arith.subf %185, %194 : vector<8x48xf32>
    %196 = arith.mulf %195, %195 : vector<8x48xf32>
    %cst_73 = arith.constant dense<0.000000e+00> : vector<8xf32>
    %197 = vector.multi_reduction <add>, %196, %cst_73 [1] : vector<8x48xf32> to vector<8xf32>
    %198 = vector.shape_cast %197 : vector<8xf32> to vector<8x1xf32>
    %cst_74 = arith.constant 0.0212765951 : f32
    %199 = vector.broadcast %cst_74 : f32 to vector<8x1xf32>
    %200 = arith.mulf %198, %199 : vector<8x1xf32>
    %201 = math.sqrt %200 : vector<8x1xf32>
    %cst_75 = arith.constant 9.99999997E-7 : f32
    %202 = vector.broadcast %cst_75 : f32 to vector<8x1xf32>
    %203 = arith.addf %201, %202 : vector<8x1xf32>
    %204 = tpu.reciprocal %203 {approx = true} : vector<8x1xf32> -> vector<8x1xf32>
    %205 = vector.broadcast %204 : vector<8x1xf32> to vector<8x48xf32>
    %206 = arith.mulf %195, %205 : vector<8x48xf32>
    %207 = vector.broadcast %187 : vector<1x48xf32> to vector<8x48xf32>
    %208 = arith.mulf %207, %206 : vector<8x48xf32>
    %209 = vector.broadcast %189 : vector<1x48xf32> to vector<8x48xf32>
    %210 = arith.addf %208, %209 : vector<8x48xf32>
    %211 = arith.truncf %210 : vector<8x48xf32> to vector<8x48xbf16>
    %c0_76 = arith.constant 0 : index
    %c0_77 = arith.constant 0 : index
    %c0_78 = arith.constant 0 : index
    %212 = vector.load %arg13[%c0_76, %c0_77, %c0_78] : memref<1x48x2048xbf16, #tpu.memory_space<vmem>>, vector<1x48x2048xbf16>
    %213 = vector.shape_cast %212 : vector<1x48x2048xbf16> to vector<48x2048xbf16>
    %cst_79 = arith.constant dense<0.000000e+00> : vector<8x2048xf32>
    %214 = tpu.matmul %211, %213, %cst_79 {dimension_numbers = #tpu.dot_dimension_numbers<[1], [0], [0], [1], [0, 0, 1, 1], [], []>} : vector<8x48xbf16>, vector<48x2048xbf16>, vector<8x2048xf32> -> vector<8x2048xf32>
    %c0_80 = arith.constant 0 : index
    %c0_81 = arith.constant 0 : index
    %c0_82 = arith.constant 0 : index
    %215 = vector.load %arg14[%c0_80, %c0_81, %c0_82] : memref<1x1x2048xf32, #tpu.memory_space<vmem>>, vector<1x1x2048xf32>
    %216 = vector.shape_cast %215 : vector<1x1x2048xf32> to vector<1x2048xf32>
    %217 = vector.broadcast %216 : vector<1x2048xf32> to vector<8x2048xf32>
    %218 = arith.addf %214, %217 : vector<8x2048xf32>
    %cst_83 = arith.constant 0.000000e+00 : f32
    %219 = vector.broadcast %cst_83 : f32 to vector<8x2048xf32>
    %220 = arith.maximumf %218, %219 : vector<8x2048xf32>
    %221 = arith.truncf %220 : vector<8x2048xf32> to vector<8x2048xbf16>
    %c0_84 = arith.constant 0 : index
    %c0_85 = arith.constant 0 : index
    %c0_86 = arith.constant 0 : index
    %222 = vector.load %arg15[%c0_84, %c0_85, %c0_86] : memref<1x2048x48xbf16, #tpu.memory_space<vmem>>, vector<1x2048x48xbf16>
    %223 = vector.shape_cast %222 : vector<1x2048x48xbf16> to vector<2048x48xbf16>
    %cst_87 = arith.constant dense<0.000000e+00> : vector<8x48xf32>
    %224 = tpu.matmul %221, %223, %cst_87 {dimension_numbers = #tpu.dot_dimension_numbers<[1], [0], [0], [1], [0, 0, 1, 1], [], []>} : vector<8x2048xbf16>, vector<2048x48xbf16>, vector<8x48xf32> -> vector<8x48xf32>
    %c0_88 = arith.constant 0 : index
    %c0_89 = arith.constant 0 : index
    %c0_90 = arith.constant 0 : index
    %225 = vector.load %arg16[%c0_88, %c0_89, %c0_90] : memref<1x1x48xf32, #tpu.memory_space<vmem>>, vector<1x1x48xf32>
    %226 = vector.shape_cast %225 : vector<1x1x48xf32> to vector<1x48xf32>
    %227 = vector.broadcast %226 : vector<1x48xf32> to vector<8x48xf32>
    %228 = arith.addf %224, %227 : vector<8x48xf32>
    %229 = arith.addf %185, %228 : vector<8x48xf32>
    %c0_91 = arith.constant 0 : index
    %c0_92 = arith.constant 0 : index
    %230 = vector.load %arg20[%c0_91, %c0_92] : memref<8x48xf32, #tpu.memory_space<vmem>>, vector<8x48xf32>
    tpu.vector_store %arg20[%c0_91, %c0_92], %229 {strides = array<i32>} : memref<8x48xf32, #tpu.memory_space<vmem>>, vector<8x48xf32>,
    %c1_i32 = arith.constant 1 : i32
    %231 = arith.cmpi eq, %arg1, %c1_i32 : i32
    %232 = arith.extui %231 : i1 to i32
    %c0_i32_93 = arith.constant 0 : i32
    %233 = arith.cmpi ne, %232, %c0_i32_93 : i32
    scf.if %233 {
      %c0_94 = arith.constant 0 : index
      %c0_95 = arith.constant 0 : index
      %c0_96 = arith.constant 0 : index
      %234 = vector.load %arg17[%c0_94, %c0_95, %c0_96] : memref<1x1x48xf32, #tpu.memory_space<vmem>>, vector<1x1x48xf32>
      %235 = vector.shape_cast %234 : vector<1x1x48xf32> to vector<1x48xf32>
      %c0_97 = arith.constant 0 : index
      %c0_98 = arith.constant 0 : index
      %c0_99 = arith.constant 0 : index
      %236 = vector.load %arg18[%c0_97, %c0_98, %c0_99] : memref<1x1x48xf32, #tpu.memory_space<vmem>>, vector<1x1x48xf32>
      %237 = vector.shape_cast %236 : vector<1x1x48xf32> to vector<1x48xf32>
      %cst_100 = arith.constant dense<0.000000e+00> : vector<8xf32>
      %238 = vector.multi_reduction <add>, %229, %cst_100 [1] : vector<8x48xf32> to vector<8xf32>
      %239 = vector.shape_cast %238 : vector<8xf32> to vector<8x1xf32>
      %cst_101 = arith.constant 4.800000e+01 : f32
      %240 = vector.broadcast %cst_101 : f32 to vector<8x1xf32>
      %241 = arith.divf %239, %240 : vector<8x1xf32>
      %242 = vector.broadcast %241 : vector<8x1xf32> to vector<8x48xf32>
      %243 = arith.subf %229, %242 : vector<8x48xf32>
      %244 = arith.mulf %243, %243 : vector<8x48xf32>
      %cst_102 = arith.constant dense<0.000000e+00> : vector<8xf32>
      %245 = vector.multi_reduction <add>, %244, %cst_102 [1] : vector<8x48xf32> to vector<8xf32>
      %246 = vector.shape_cast %245 : vector<8xf32> to vector<8x1xf32>
      %cst_103 = arith.constant 0.0212765951 : f32
      %247 = vector.broadcast %cst_103 : f32 to vector<8x1xf32>
      %248 = arith.mulf %246, %247 : vector<8x1xf32>
      %249 = math.sqrt %248 : vector<8x1xf32>
      %cst_104 = arith.constant 9.99999997E-7 : f32
      %250 = vector.broadcast %cst_104 : f32 to vector<8x1xf32>
      %251 = arith.addf %249, %250 : vector<8x1xf32>
      %252 = tpu.reciprocal %251 {approx = true} : vector<8x1xf32> -> vector<8x1xf32>
      %253 = vector.broadcast %252 : vector<8x1xf32> to vector<8x48xf32>
      %254 = arith.mulf %243, %253 : vector<8x48xf32>
      %255 = vector.broadcast %235 : vector<1x48xf32> to vector<8x48xf32>
      %256 = arith.mulf %255, %254 : vector<8x48xf32>
      %257 = vector.broadcast %237 : vector<1x48xf32> to vector<8x48xf32>
      %258 = arith.addf %256, %257 : vector<8x48xf32>
      %c0_105 = arith.constant 0 : index
      %c0_106 = arith.constant 0 : index
      %c0_107 = arith.constant 0 : index
      %259 = vector.load %arg19[%c0_105, %c0_106, %c0_107] : memref<1x8x48xf32, #tpu.memory_space<vmem>>, vector<1x8x48xf32>
      %260 = vector.shape_cast %259 : vector<1x8x48xf32> to vector<8x48xf32>
      %261 = vector.shape_cast %258 : vector<8x48xf32> to vector<1x8x48xf32>
      tpu.vector_store %arg19[%c0_105, %c0_106, %c0_107], %261 {strides = array<i32>} : memref<1x8x48xf32, #tpu.memory_space<vmem>>, vector<1x8x48xf32>,
    } else {
    }
    return
  }
  func.func @transform_0(%arg0: i32, %arg1: i32) -> (i32, i32, i32) {
    %c0_i32 = arith.constant 0 : i32
    %c0_i32_0 = arith.constant 0 : i32
    %c0_i32_1 = arith.constant 0 : i32
    return %arg0, %c0_i32, %c0_i32_0 : i32, i32, i32
  }
  func.func @transform_1(%arg0: i32, %arg1: i32) -> (i32, i32, i32) {
    %c0_i32 = arith.constant 0 : i32
    %c0_i32_0 = arith.constant 0 : i32
    %c0_i32_1 = arith.constant 0 : i32
    return %arg0, %c0_i32, %c0_i32_0 : i32, i32, i32
  }
  func.func @transform_2(%arg0: i32, %arg1: i32) -> (i32, i32, i32) {
    %c0_i32 = arith.constant 0 : i32
    %c0_i32_0 = arith.constant 0 : i32
    %c0_i32_1 = arith.constant 0 : i32
    return %arg1, %c0_i32, %c0_i32_0 : i32, i32, i32
  }
  func.func @transform_3(%arg0: i32, %arg1: i32) -> (i32, i32, i32) {
    %c0_i32 = arith.constant 0 : i32
    %c0_i32_0 = arith.constant 0 : i32
    %c0_i32_1 = arith.constant 0 : i32
    return %arg1, %c0_i32, %c0_i32_0 : i32, i32, i32
  }
  func.func @transform_4(%arg0: i32, %arg1: i32) -> (i32, i32, i32) {
    %c0_i32 = arith.constant 0 : i32
    %c0_i32_0 = arith.constant 0 : i32
    %c0_i32_1 = arith.constant 0 : i32
    return %arg1, %c0_i32, %c0_i32_0 : i32, i32, i32
  }
  func.func @transform_5(%arg0: i32, %arg1: i32) -> (i32, i32, i32) {
    %c0_i32 = arith.constant 0 : i32
    %c0_i32_0 = arith.constant 0 : i32
    %c0_i32_1 = arith.constant 0 : i32
    return %arg1, %c0_i32, %c0_i32_0 : i32, i32, i32
  }
  func.func @transform_6(%arg0: i32, %arg1: i32) -> (i32, i32, i32) {
    %c0_i32 = arith.constant 0 : i32
    %c0_i32_0 = arith.constant 0 : i32
    %c0_i32_1 = arith.constant 0 : i32
    return %arg1, %c0_i32, %c0_i32_0 : i32, i32, i32
  }
  func.func @transform_7(%arg0: i32, %arg1: i32) -> (i32, i32, i32) {
    %c0_i32 = arith.constant 0 : i32
    %c0_i32_0 = arith.constant 0 : i32
    %c0_i32_1 = arith.constant 0 : i32
    return %arg1, %c0_i32, %c0_i32_0 : i32, i32, i32
  }
  func.func @transform_8(%arg0: i32, %arg1: i32) -> (i32, i32, i32) {
    %c0_i32 = arith.constant 0 : i32
    %c0_i32_0 = arith.constant 0 : i32
    %c0_i32_1 = arith.constant 0 : i32
    return %arg1, %c0_i32, %c0_i32_0 : i32, i32, i32
  }
  func.func @transform_9(%arg0: i32, %arg1: i32) -> (i32, i32, i32) {
    %c0_i32 = arith.constant 0 : i32
    %c0_i32_0 = arith.constant 0 : i32
    %c0_i32_1 = arith.constant 0 : i32
    return %arg1, %c0_i32, %c0_i32_0 : i32, i32, i32
  }
  func.func @transform_10(%arg0: i32, %arg1: i32) -> (i32, i32, i32) {
    %c0_i32 = arith.constant 0 : i32
    %c0_i32_0 = arith.constant 0 : i32
    %c0_i32_1 = arith.constant 0 : i32
    return %arg1, %c0_i32, %c0_i32_0 : i32, i32, i32
  }
  func.func @transform_11(%arg0: i32, %arg1: i32) -> (i32, i32, i32) {
    %c0_i32 = arith.constant 0 : i32
    %c0_i32_0 = arith.constant 0 : i32
    %c0_i32_1 = arith.constant 0 : i32
    return %arg1, %c0_i32, %c0_i32_0 : i32, i32, i32
  }
  func.func @transform_12(%arg0: i32, %arg1: i32) -> (i32, i32, i32) {
    %c0_i32 = arith.constant 0 : i32
    %c0_i32_0 = arith.constant 0 : i32
    %c0_i32_1 = arith.constant 0 : i32
    return %arg1, %c0_i32, %c0_i32_0 : i32, i32, i32
  }
  func.func @transform_13(%arg0: i32, %arg1: i32) -> (i32, i32, i32) {
    %c0_i32 = arith.constant 0 : i32
    %c0_i32_0 = arith.constant 0 : i32
    %c0_i32_1 = arith.constant 0 : i32
    return %arg1, %c0_i32, %c0_i32_0 : i32, i32, i32
  }
  func.func @transform_14(%arg0: i32, %arg1: i32) -> (i32, i32, i32) {
    %c0_i32 = arith.constant 0 : i32
    %c0_i32_0 = arith.constant 0 : i32
    %c0_i32_1 = arith.constant 0 : i32
    return %arg1, %c0_i32, %c0_i32_0 : i32, i32, i32
  }
  func.func @transform_15(%arg0: i32, %arg1: i32) -> (i32, i32, i32) {
    %c0_i32 = arith.constant 0 : i32
    %c0_i32_0 = arith.constant 0 : i32
    %c0_i32_1 = arith.constant 0 : i32
    %c0_i32_2 = arith.constant 0 : i32
    return %c0_i32, %c0_i32_0, %c0_i32_1 : i32, i32, i32
  }
  func.func @transform_16(%arg0: i32, %arg1: i32) -> (i32, i32, i32) {
    %c0_i32 = arith.constant 0 : i32
    %c0_i32_0 = arith.constant 0 : i32
    %c0_i32_1 = arith.constant 0 : i32
    %c0_i32_2 = arith.constant 0 : i32
    return %c0_i32, %c0_i32_0, %c0_i32_1 : i32, i32, i32
  }
  func.func @transform_17(%arg0: i32, %arg1: i32) -> (i32, i32, i32) {
    %c0_i32 = arith.constant 0 : i32
    %c0_i32_0 = arith.constant 0 : i32
    %c0_i32_1 = arith.constant 0 : i32
    return %arg0, %c0_i32, %c0_i32_0 : i32, i32, i32
  }
}

</mosaic_0001>

<bundles_post_ra>
// kernel: tpu_custom_call.1
= control target key start
LH: loop header
LB: loop body
LE: loop exit
PB: predicated region body
PF: predicated region fallthrough
CT: control target
= control target key end

     0   :  { %s5538_s0 = inlined_call_operand.vmem [shape: f32[2,8,48], index: 0, kind: input, shape index: {}]   ;;  %s5539_s1 = inlined_call_operand.vmem [shape: f32[2,1,8], index: 1, kind: input, shape index: {}]   ;;  %s5540_s2 = inlined_call_operand.vmem [shape: f32[2,1,48], index: 2, kind: input, shape index: {}]   ;;  %s5541_s3 = inlined_call_operand.vmem [shape: f32[2,1,48], index: 3, kind: input, shape index: {}]   ;;  %s5542_s4 = inlined_call_operand.vmem [shape: bf16[2,48,48], index: 4, kind: input, shape index: {}]   ;;  %s5543_s5 = inlined_call_operand.vmem [shape: bf16[2,48,48], index: 5, kind: input, shape index: {}]   ;;  %s5544_s6 = inlined_call_operand.vmem [shape: bf16[2,48,48], index: 6, kind: input, shape index: {}]   ;;  %s5545_s7 = inlined_call_operand.vmem [shape: bf16[2,48,48], index: 7, kind: input, shape index: {}]   ;;  %s5546_s8 = inlined_call_operand.vmem [shape: f32[2,1,48], index: 8, kind: input, shape index: {}]   ;;  %s5547_s9 = inlined_call_operand.vmem [shape: f32[2,1,48], index: 9, kind: input, shape index: {}]   ;;  %s5548_s10 = inlined_call_operand.vmem [shape: f32[2,1,48], index: 10, kind: input, shape index: {}]   ;;  %s5549_s11 = inlined_call_operand.vmem [shape: bf16[2,48,2048], index: 11, kind: input, shape index: {}]   ;;  %s5550_s12 = inlined_call_operand.vmem [shape: f32[2,1,2048], index: 12, kind: input, shape index: {}]   ;;  %s5551_s13 = inlined_call_operand.vmem [shape: bf16[2,2048,48], index: 13, kind: input, shape index: {}]   ;;  %s5552_s14 = inlined_call_operand.vmem [shape: f32[2,1,48], index: 14, kind: input, shape index: {}]   ;;  %s5553_s15 = inlined_call_operand.vmem [shape: f32[1,1,48], index: 15, kind: input, shape index: {}]   ;;  %s5554_s16 = inlined_call_operand.vmem [shape: f32[1,1,48], index: 16, kind: input, shape index: {}]   ;;  %s5555_s17 = inlined_call_operand.hbm [shape: f32[2,8,48], index: 17, kind: output, shape index: {}]  }
   0x1   :  { %5571 = sst [smem:[#allocation19_spill]] %s5538_s0 }
   0x2   :  { %5572 = sst [smem:[#allocation20_spill]] %s5539_s1 }
   0x3   :  { %5573 = sst [smem:[#allocation21_spill]] %s5542_s4 }
   0x4   :  { %5574 = sst [smem:[#allocation22_spill]] %s5543_s5 }
   0x5   :  { %5575 = sst [smem:[#allocation23_spill]] %s5544_s6 }
   0x6   :  { %5576 = sst [smem:[#allocation24_spill]] %s5545_s7 }
   0x7   :  { %5577 = sst [smem:[#allocation25_spill]] %s5546_s8 }
   0x8   :  { %5578 = sst [smem:[#allocation26_spill]] %s5547_s9 }
   0x9   :  { %5579 = sst [smem:[#allocation27_spill]] %s5548_s10 }
   0xa   :  { %5580 = sst [smem:[#allocation28_spill]] %s5550_s12 }
   0xb   :  { %5581 = sst [smem:[#allocation29_spill]] %s5551_s13 }
   0xc   :  { %5582 = sst [smem:[#allocation30_spill]] %s5552_s14 }
   0xd   :  { %5583 = sst [smem:[#allocation31_spill]] %s5553_s15 }
   0xe   :  { %5584 = sst [smem:[#allocation32_spill]] %s5554_s16 }
   0xf   :  { %5585 = sst [smem:[#allocation33_spill]] %s5555_s17 }
  0x10   :  { %22 = vsyncpa [#allocation4], 0 }
  0x11   :  { %24 = vsyncpa [#allocation4 + $0x1], 0  ;;  %s4859_s24 = smov 0   ;;  %s4861_s25 = smov 0  }
  0x12   :  { %s4863_s26 = smov 0   ;;  %s4865_s27 = smov 0  }
  0x13   :  { %s4867_s28 = smov 0   ;;  %s4869_s29 = smov 0  }
  0x14   :  { %s4871_s0 = smov 0   ;;  %s4873_s30 = smov 0  }
  0x15 LB: > { %5586 = sst [smem:[#allocation6_spill]] %s4733_s24  ;;  %s3557_s18 = sadd.s32 4294967295, %s4761_s30   ;;  %s4761_s30 = sphi %s4873_s30, %s30_s30   ;;  %s4757_s0 = sphi %s4871_s0, %s5642_s0   ;;  %s4753_s29 = sphi %s4869_s29, %s5641_s29   ;;  %s4749_s28 = sphi %s4867_s28, %s5640_s28   ;;  %s4745_s27 = sphi %s4865_s27, %s5639_s27   ;;  %s4741_s26 = sphi %s4863_s26, %s5638_s26   ;;  %s4737_s25 = sphi %s4861_s25, %s5637_s25   ;;  %s4733_s24 = sphi %s4859_s24, %s5636_s24  }
  0x16   : > { %5587 = sst [smem:[#allocation7_spill]] %s4737_s25  ;;  %s3558_s19 = sadd.s32 4294967294, %s4761_s30  }
  0x17   : > { %5588 = sst [smem:[#allocation8_spill]] %s4741_s26  ;;  %s39_s1 = sadd.s32 1, %s4753_s29 }
  0x18   : > { %5589 = sst [smem:[#allocation9_spill]] %s4745_s27  ;;  %p40_p0 = scmp.ge.s32.totalorder %s39_s1, 2 }
  0x19   : > { %5590 = sst [smem:[#allocation10_spill]] %s4749_s28  ;;  %s42_s20 = sadd.s32 1, %s4757_s0 }
  0x1a   : > { %5591 = sst [smem:[#allocation11_spill]] %s4753_s29  ;;  %p491_p1 = scmp.ne.s32.totalorder %s4741_s26, %s4737_s25 }
  0x1b   : > { %5592 = sst [smem:[#allocation12_spill]] %s4757_s0  ;;  %p492_p2 = scmp.eq.s32.totalorder %s3557_s18, 3 }
  0x1c   : > { %5593 = sst [smem:[#allocation13_spill]] %s4761_s30  ;;  %s5644_s1 = smov (%p40_p0, %s39_s1), 0 }
  0x1d   : > { %5594 = sst [smem:[#allocation14_spill]] %s5644_s1  ;;  %s5646_s20 = smov (!%p40_p0, %s42_s20), %s4757_s0 }
  0x1e   : > { %p4908_p3 = por %p492_p2, %p491_p1  ;;  %p497_p4 = scmp.ne.s32.totalorder %s4737_s25, %s4733_s24 }
  0x1f   : > { %p44_p5 = scmp.ge.s32.totalorder %s5646_s20, 2  ;;  %p498_p6 = scmp.eq.s32.totalorder %s3558_s19, 3 }
  0x20   : > { %s5595_s21 = scalar_select %p4908_p3, 1, 0 }
  0x21   : > { %p3561_p7 = scmp.ge.s32.totalorder %s4761_s30, 1  ;;  %p626_p8 = scmp.lt.s32.totalorder %s4761_s30, 5 }
  0x22   : > { %5596 = sst [smem:[#allocation15_spill]] %s5595_s21  ;;  %s5648_s20 = smov (%p44_p5, %s5646_s20), 0 }
  0x23   : > { %5597 = sst [smem:[#allocation16_spill]] %s5648_s20  ;;  %p4918_p9 = por %p498_p6, %p497_p4 }
  0x24   : > { %p627_p10 = pnand %p3561_p7, %p626_p8  ;;  %s478_s23 = ssub.s32 %s4757_s0, %s5648_s20 }
  0x25   : > { %s5598_s22 = scalar_select %p4918_p9, 1, 0 }
  0x26   : > { %s481_s18 = sadd.s32 1, %s4741_s26  ;;  %p479_p11 = scmp.eq.s32.totalorder %s478_s23, 0 }
  0x27   : > { %5599 = sst [smem:[#allocation17_spill]] %s5598_s22  ;;  %630 = sbr.rel (%p627_p10) target bundleno = 3172 (0xc64), region = 88 }
  0x28   : > { %s4926_s1 = scalar_select %p479_p11, %s4741_s26, %s481_s18  }
  0x29   : > { %s5559_s19 = sand.u32 (!%p627_p10), 1, %s4737_s25   ;;  %p732_p12 = scmp.lt.s32.totalorder (!%p627_p10), %s4749_s28, 1 }
  0x2a   : > { %5600 = sst [smem:[#allocation18_spill]] %s4926_s1  ;;  %s4932_s29 = sshll.u32 (!%p627_p10), %s5559_s19, 3 }
  0x2b   : > { %p739_p13 = scmp.lt.s32.totalorder (!%p627_p10), %s4745_s27, 1  ;;  %s5602_s30 = sld [smem:[#allocation19_spill]] (!%p627_p10) }
  0x2c   : > { %s4936_s22 = scalar_select %p732_p12, %s4749_s28, 1 }
  0x2d   : > { %s4939_s23 = scalar_select %p739_p13, %s4745_s27, 1 }
  0x2e   : > { %s3563_s18 = sshll.u32 %s4936_s22, 3  ;;  %s5605_s4 = sld [smem:[#allocation21_spill]] }
  0x2f   : > { %s4541_s14 = smul.u32 24, %s4939_s23  ;;  %s5606_s5 = sld [smem:[#allocation22_spill]] }
  0x30   : > { %s5607_s6 = sld [smem:[#allocation23_spill]]  ;;  %s3569_s20 = sshll.u32 %s4939_s23, 4 }
  0x31   : > { %s735_s17 = scalar_lea.vmem %s5602_s30, %s3563_s18  ;;  %s5608_s7 = sld [smem:[#allocation24_spill]] }
  0x32   : > { %s4542_s30 = smul.u32 384, %s4939_s23  ;;  %s4355_s28 = sshll.u32 %s4939_s23, 10 }
  0x33   : > { %s5611_s13 = sld [smem:[#allocation29_spill]]  ;;  %s731_s9 = scalar_lea.vmem [#allocation3], %s4932_s29 }
  0x34   : > { %s4969_s25 = scalar_lea.vmem %s5605_s4, %s4541_s14  ;;  %s4996_s4 = scalar_lea.vmem %s5549_s11, %s4542_s30 }
  0x35   : > { %s4974_s15 = scalar_lea.vmem %s5606_s5, %s4541_s14  ;;  %s5610_s5 = sld [smem:[#allocation28_spill]] }
  0x36   : > { %s4979_s27 = scalar_lea.vmem %s5607_s6, %s4541_s14  ;;  %s5612_s26 = sld [smem:[#allocation30_spill]] }
  0x37   : > { %s4984_s0 = scalar_lea.vmem %s5608_s7, %s4541_s14  ;;  %s5613_s8 = sld [smem:[#allocation9_spill]] }
  0x39   : > { %s5006_s7 = scalar_lea.vmem %s5611_s13, %s4355_s28 }
  0x3b   : > { %s5001_s6 = scalar_lea.vmem %s5610_s5, %s3569_s20 }
  0x3c   : > { %s790_s10 = scalar_lea.vmem %s5612_s26, %s4939_s23 }
  0x3d   : > { %p3572_p0 = scmp.ne.s32.totalorder %s5613_s8, 0 }
  0x3f   : > { %795 = sbr.rel (%p3572_p0) target bundleno = 70 (0x46), region = 92 }
  0x44   : > { %v796_v0 = vld [vmem:[%s735_s17] sm:$0xff]  ;;  %vm797_vm0 = vcmask 392192  }
  0x45   : > { %798 = vst.msk [vmem:[#allocation2] sm:$0xff] %vm797_vm0, %v796_v0 }
  0x46 PF: > { %vm803_vm1 = vcmask 392192   ;;  %v4763_v3 = vmov 48.0   ;;  %v4358_v15 = vld [vmem:[%s4969_s25 + $0x10] sm:$0xff]  ;;  %v4357_v18 = vld [vmem:[%s4969_s25 + $0x8] sm:$0xff]  ;;  %v4356_v21 = vld [vmem:[%s4969_s25] sm:$0xff]  ;;  %s5614_s17 = scalar_lea.vmem %s5540_s2, %s4939_s23  ;;  %s5615_s20 = scalar_lea.vmem %s5541_s3, %s4939_s23  ;;  %vm972_vm5 = vcmask 64512  }
  0x47   : > { %4627 = vrcp.f32 %v4763_v3  ;;  %v4361_v16 = vld [vmem:[%s4974_s15 + $0x10] sm:$0xff]  ;;  %877 = vmatpush.bf16.msra.mxu0 %v4358_v15  ;;  %v4360_v19 = vld [vmem:[%s4974_s15 + $0x8] sm:$0xff]  ;;  %v4359_v22 = vld [vmem:[%s4974_s15] sm:$0xff]  ;;  %s4764_s25 = smov 104   ;;  %s4765_s15 = smov 120   ;;  %vm1007_vm6 = vcmask 1043456  }
  0x48   : > { %v4364_v17 = vld [vmem:[%s4979_s27 + $0x10] sm:$0xff]  ;;  %915 = vmatpush.bf16.msra.mxu1 %v4361_v16  ;;  %v4363_v20 = vld [vmem:[%s4979_s27 + $0x8] sm:$0xff]  ;;  %v4362_v23 = vld [vmem:[%s4979_s27] sm:$0xff]  ;;  %s4766_s26 = smov 112   ;;  %s5616_s18 = sld [smem:[#allocation20_spill]] }
  0x49   : > { %952 = vmatpush.bf16.msra.mxu2 %v4364_v17  ;;  %v4620_v37 = vld [vmem:[%s5614_s17] ss:$0 sm:$0xff]  ;;  %s4768_s16 = smov 88   ;;  %s5618_s14 = sld [smem:[#allocation25_spill]] }
  0x4a   : > { %v4621_v40 = vld [vmem:[%s5615_s20] ss:$0 sm:$0xff]  ;;  %s5620_s5 = sld [smem:[#allocation26_spill]] }
  0x4b   : > { %878 = vmatpush.bf16.msra.mxu0 %v4357_v18  ;;  %s5622_s28 = sld [smem:[#allocation27_spill]] }
  0x4c   : > { %v5014_v1 = vld [vmem:[#allocation2] sm:$0xff]  ;;  %916 = vmatpush.bf16.msra.mxu1 %v4360_v19 }
  0x4d   : > { %v804_v2 = vsel %vm803_vm1, %v5014_v1, 0.0  ;;  %v4628_v4 = vpop.eup %4627  ;;  %953 = vmatpush.bf16.msra.mxu2 %v4363_v20 }
  0x4e   : > { %805 = vadd.xlane.f32.xlu0 %v804_v2  ;;  %v808_v5 = vmul.f32 48.0, %v4628_v4  ;;  %vm812_vm2 = vweird.f32 %v4628_v4  ;;  %s5617_s1 = scalar_lea.vmem %s5616_s18, %s4936_s22  ;;  %s4767_s22 = smov 96  }
  0x4f   : > { %879 = vmatpush.bf16.msra.mxu0 %v4356_v21  ;;  %v5072_v63 = vld [vmem:[%s5617_s1] ss:$0 sm:$0xff]  ;;  %s5619_s13 = scalar_lea.vmem %s5618_s14, %s4939_s23 }
  0x50   : > { %v809_v6 = vsub.f32 1.0, %v808_v5  ;;  %917 = vmatpush.bf16.msra.mxu1 %v4359_v22  ;;  %v963_v22 = vld [vmem:[%s4984_s0] sm:$0xf]  ;;  %s5621_s8 = scalar_lea.vmem %s5620_s5, %s4939_s23 }
  0x51   : > { %954 = vmatpush.bf16.msra.mxu2 %v4362_v23  ;;  %v1114_v23 = vsel %vm1007_vm6, %v963_v22, 0  ;;  %s5623_s20 = scalar_lea.vmem %s5622_s28, %s4939_s23 }
  0x52   : > { %v810_v7 = vmul.f32 %v4628_v4, %v809_v6 }
  0x54   : > { %v811_v8 = vadd.f32 %v4628_v4, %v810_v7 }
  0x56   : > { %v5018_v9 = vsel %vm812_vm2, %v4628_v4, %v811_v8 }
  0xc1   : > { %v806_v10 = vpop.xlane.xlu0 %805 }
  0xc2   : > { %v814_v11 = vmul.f32 %v5018_v9, %v806_v10 }
  0xc4   : > { %v815_v12 = vsub.f32 %v5014_v1, %v814_v11 }
  0xc6   : > { %v816_v13 = vmul.f32 %v815_v12, %v815_v12 }
  0xc8   : > { %v817_v14 = vsel %vm803_vm1, %v816_v13, 0.0 }
  0xc9   : > { %818 = vadd.xlane.f32.xlu0 %v817_v14 }
 0x13c   : > { %v819_v24 = vpop.xlane.xlu0 %818 }
 0x13d   : > { %v820_v25 = vmul.f32 0.021276595, %v819_v24 }
 0x13f   : > { %4629 = vrsqrt.f32 %v820_v25  ;;  %vm828_vm3 = vcmp.eq.f32.partialorder %v820_v25, inf  ;;  %v831_v33 = vand.u32 2147483648, %v820_v25  ;;  %vm830_vm4 = vcmp.eq.f32.partialorder %v820_v25, 0.0 }
 0x145   : > { %v4630_v26 = vpop.eup %4629 }
 0x146   : > { %v822_v27 = vmul.f32 %v4630_v26, %v820_v25 }
 0x148   : > { %v823_v28 = vmul.f32 %v4630_v26, %v822_v27 }
 0x14a   : > { %v824_v29 = vmul.f32 0.5, %v823_v28 }
 0x14c   : > { %v825_v30 = vsub.f32 1.5, %v824_v29 }
 0x14e   : > { %v826_v31 = vmul.f32 %v4630_v26, %v825_v30 }
 0x150   : > { %v827_v32 = vmul.f32 %v826_v31, %v820_v25 }
 0x152   : > { %v829_v34 = vsel %vm828_vm3, %v820_v25, %v827_v32 }
 0x153   : > { %v832_v35 = vsel %vm830_vm4, %v831_v33, %v829_v34 }
 0x154   : > { %v833_v36 = vadd.f32 1e-06, %v832_v35 }
 0x156   : > { %4631 = vrcp.f32 %v833_v36 }
 0x15c   : > { %v4632_v38 = vpop.eup %4631 }
 0x15d   : > { %v835_v39 = vmul.f32 %v4632_v38, %v815_v12 }
 0x15f   : > { %v839_v41 = vmul.f32 %v4620_v37, %v835_v39 }
 0x161   : > { %v843_v42 = vadd.f32 %v4621_v40, %v839_v41 }
 0x163   : > { %v844_v43 = vpack.c.bf16 %v843_v42, %v843_v42 }
 0x165   : > { %3585 = vmatmul.msk.bf16.vlgmr.msra.gmra.mxu0 %vm803_vm1, %v844_v43  ;;  %3598 = vmatmul.msk.bf16.vlgmr.msra.gmra.mxu1 %vm803_vm1, %v844_v43 }
 0x166   : > { %3611 = vmatmul.msk.bf16.vlgmr.msra.gmra.mxu2 %vm803_vm1, %v844_v43 }
 0x1e2   : > { %v881_v44 = vpop.f32.mrf.mxu0  ;;  %v919_v45 = vpop.f32.mrf.mxu1 }
 0x1e3   : > { %v885_v46 = vmul.f32 0.35355338, %v881_v44  ;;  %v961_v47 = vpack.c.bf16 %v919_v45, %v919_v45 }
 0x1e5   : > { %v1031_v48 = vunpack.c.l.b16 %v961_v47  ;;  %v977_v49 = vsel %vm972_vm5, %v961_v47, 0  ;;  %v960_v50 = vpack.c.bf16 %v885_v46, %v885_v46 }
 0x1e6   : > { %986 = vmatpush.bf16.xpose.msra.mxu3 %v977_v49 }
 0x1e7   : > { %v5046_v51 = vpack.c.b16 %v1031_v48, %v1031_v48  ;;  %v1026_v56 = vunpack.c.l.b16 %v960_v50 }
 0x1e9   : > { %v956_v52 = vpop.f32.mrf.mxu2  ;;  %1208 = vrot.lane.b32.xlu0 %v5046_v51, %s4764_s25  ;;  %1033 = vrot.lane.b32.xlu2 %v5046_v51, %s4765_s15  ;;  %v5057_v58 = vpack.c.b16 %v1026_v56, %v1026_v56 }
 0x1ea   : > { %v5052_v53 = vpack.c.bf16 %v956_v52, %v956_v52  ;;  %v883_v54 = vpop.f32.mrf.mxu0  ;;  %v921_v55 = vpop.f32.mrf.mxu1 }
 0x1ec   : > { %v1009_v57 = vsel %vm1007_vm6, %v5052_v53, 0  ;;  %v1067_v39 = vunpack.c.l.b16 %v5052_v53 }
 0x1ed   : > { %3612 = vmatmul.msk.bf16.vlgmr.msra.gmra.mxu3 %vm972_vm5, %v960_v50 }
 0x1ee   : > { %1018 = vmatpush.bf16.msrb.mxu3 %v1009_v57  ;;  %v5093_v40 = vpack.c.b16 %v1067_v39, %v1067_v39 }
 0x1f1   : > { %v958_v59 = vpop.f32.mrf.mxu2  ;;  %1028 = vrot.lane.b32.xlu2 %v5057_v58, %s4765_s15 }
 0x1f2   : > { %1123 = vmatpush.bf16.msra.mxu3 %v1114_v23  ;;  %v964_v59 = vld [vmem:[%s4984_s0 + $0x4] sm:$0xf] }
 0x1f9   : > { %1206 = vrot.lane.b32.xlu2 %v5057_v58, %s4764_s25 }
 0x201   : > { %1129 = vrot.lane.b32.xlu2 %v5057_v58, %s4766_s26 }
 0x243   : > { %v1034_v60 = vpop.permute.xlu2 %1033 }
 0x244   : > { %v1039_v61 = vsel %vm972_vm5, %v1034_v60, 0  ;;  %v1095_v60 = vsel %vm1007_vm6, %v964_v59, 0 }
 0x245   : > { %1048 = vmatpush.bf16.xpose.msrb.mxu0 %v1039_v61  ;;  %1104 = vmatpush.bf16.msrb.mxu2 %v1095_v60  ;;  %v965_v61 = vld [vmem:[%s4984_s0 + $0x8] sm:$0xf] }
 0x24b   : > { %v1029_v62 = vpop.permute.xlu2 %1028 }
 0x24c   : > { %3614 = vmatmul.msk.bf16.vlgmr.msrb.gmra.mxu0 %vm972_vm5, %v1029_v62  ;;  %v1190_v62 = vsel %vm1007_vm6, %v965_v61, 0 }
 0x24d   : > { %1199 = vmatpush.bf16.msra.mxu2 %v1190_v62 }
 0x253   : > { %v1207_v15 = vpop.permute.xlu2 %1206 }
 0x25b   : > { %v1130_v16 = vpop.permute.xlu2 %1129  ;;  %v1209_v27 = vpop.permute.xlu0 %1208 }
 0x25c   : > { %v1214_v29 = vsel %vm972_vm5, %v1209_v27, 0 }
 0x270   : > { %v988_v0 = vpop.f32.mrf.mxu3 }
 0x271   : > { %v989_v2 = vadd.f32 %v5072_v63, %v988_v0 }
 0x273   : > { %v992_v3 = vsel %vm972_vm5, %v989_v2, -inf }
 0x274   : > { %993 = vmax.xlane.f32.xlu1 %v992_v3  ;;  %v966_v3 = vld [vmem:[%s4984_s0 + $0xc] sm:$0xf] }
 0x278   : > { %v990_v4 = vpop.f32.mrf.mxu3 }
 0x2c9   : > { %v1050_v5 = vpop.f32.mrf.mxu0 }
 0x2ca   : > { %v1051_v6 = vadd.f32 %v5072_v63, %v1050_v5 }
 0x2cc   : > { %v1054_v7 = vsel %vm972_vm5, %v1051_v6, -inf }
 0x2cd   : > { %1055 = vmax.xlane.f32.xlu2 %v1054_v7 }
 0x2d1   : > { %v1052_v8 = vpop.f32.mrf.mxu0 }
 0x2e7   : > { %v994_v10 = vpop.xlane.xlu1 %993 }
 0x2e8   : > { %v995_v11 = vsub.f32 %v989_v2, %v994_v10  ;;  %v1267_v10 = vsel %vm1007_vm6, %v966_v3, 0 }
 0x2ea   : > { %v996_v12 = vmul.f32 1.442695, %v995_v11 }
 0x2ec   : > { %4633 = vpow2.f32 %v996_v12 }
 0x2f2   : > { %v4634_v13 = vpop.eup %4633 }
 0x2f3   : > { %v998_v14 = vsel %vm972_vm5, %v4634_v13, 0.0 }
 0x2f4   : > { %999 = vadd.xlane.f32.xlu1 %v998_v14 }
 0x30d   : > { %1131 = vrot.lane.b32.xlu1 %v5046_v51, %s4766_s26 }
 0x340   : > { %v1056_v17 = vpop.xlane.xlu2 %1055 }
 0x341   : > { %v1057_v18 = vsub.f32 %v1051_v6, %v1056_v17 }
 0x343   : > { %v1058_v19 = vmul.f32 1.442695, %v1057_v18 }
 0x345   : > { %4635 = vpow2.f32 %v1058_v19 }
 0x34b   : > { %v4636_v20 = vpop.eup %4635 }
 0x34c   : > { %v1060_v21 = vsel %vm972_vm5, %v4636_v20, 0.0 }
 0x34d   : > { %1061 = vadd.xlane.f32.xlu2 %v1060_v21 }
 0x367   : > { %v1000_v24 = vpop.xlane.xlu1 %999 }
 0x368   : > { %4637 = vrcp.f32 %v1000_v24 }
 0x36e   : > { %v4638_v25 = vpop.eup %4637 }
 0x36f   : > { %v1002_v26 = vmul.f32 %v4638_v25, %v4634_v13 }
 0x371   : > { %v1003_v28 = vpack.c.bf16 %v1002_v26, %v1002_v26 }
 0x373   : > { %3613 = vmatmul.msk.bf16.vlgmr.msrb.gmra.mxu3 %vm972_vm5, %v1003_v28 }
 0x374   : > { %1223 = vmatpush.bf16.xpose.msrb.mxu3 %v1214_v29 }
 0x37f   : > { %v1132_v30 = vpop.permute.xlu1 %1131 }
 0x380   : > { %v1137_v31 = vsel %vm972_vm5, %v1132_v30, 0 }
 0x381   : > { %1146 = vmatpush.bf16.xpose.msra.mxu0 %v1137_v31 }
 0x388   : > { %3618 = vmatmul.msk.bf16.vlgmr.msra.gmra.mxu0 %vm972_vm5, %v1130_v16 }
 0x3c0   : > { %v1062_v45 = vpop.xlane.xlu2 %1061 }
 0x3f6   : > { %v1020_v32 = vpop.f32.mrf.mxu3 }
 0x3f7   : > { %v1024_v33 = vpack.c.bf16 %v1020_v32, %v1020_v32 }
 0x3f9   : > { %3617 = vmatmul.msk.bf16.vlgmr.msra.gmra.mxu3 %vm972_vm5, %v1024_v33 }
 0x3fe   : > { %v1022_v34 = vpop.f32.mrf.mxu3 }
 0x405   : > { %v1148_v35 = vpop.f32.mrf.mxu0 }
 0x406   : > { %v1149_v36 = vadd.f32 %v5072_v63, %v1148_v35 }
 0x408   : > { %v1152_v37 = vsel %vm972_vm5, %v1149_v36, -inf }
 0x409   : > { %3621 = vmatmul.msk.bf16.vlgmr.msrb.gmra.mxu3 %vm972_vm5, %v1207_v15  ;;  %1153 = vmax.xlane.f32.xlu0 %v1152_v37 }
 0x40d   : > { %v1150_v38 = vpop.f32.mrf.mxu0 }
 0x41d   : > { %1069 = vrot.lane.b32.xlu0 %v5093_v40, %s4765_s15 }
 0x425   : > { %1285 = vrot.lane.b32.xlu0 %v5046_v51, %s4767_s22 }
 0x42d   : > { %1362 = vrot.lane.b32.xlu0 %v5046_v51, %s4768_s16 }
 0x435   : > { %1360 = vrot.lane.b32.xlu0 %v5057_v58, %s4768_s16 }
 0x47c   : > { %v5103_v41 = vpop.f32.mrf.mxu3  ;;  %v1154_v42 = vpop.xlane.xlu0 %1153 }
 0x47d   : > { %v1155_v43 = vsub.f32 %v1149_v36, %v1154_v42 }
 0x47f   : > { %v1156_v44 = vmul.f32 1.442695, %v1155_v43 }
 0x481   : > { %4639 = vpow2.f32 %v1156_v44 }
 0x482   : > { %4641 = vrcp.f32 %v1062_v45 }
 0x484   : > { %v1127_v46 = vpop.f32.mrf.mxu3 }
 0x487   : > { %v4640_v47 = vpop.eup %4639 }
 0x488   : > { %v1158_v48 = vsel %vm972_vm5, %v4640_v47, 0.0  ;;  %v4642_v49 = vpop.eup %4641 }
 0x489   : > { %1159 = vadd.xlane.f32.xlu2 %v1158_v48  ;;  %v1064_v52 = vmul.f32 %v4642_v49, %v4636_v20 }
 0x48b   : > { %v1065_v56 = vpack.c.bf16 %v1064_v52, %v1064_v52 }
 0x48c   : > { %v1225_v50 = vpop.f32.mrf.mxu3 }
 0x48d   : > { %v1226_v51 = vadd.f32 %v5072_v63, %v1225_v50 }
 0x48f   : > { %v1070_v53 = vpop.permute.xlu0 %1069  ;;  %v1229_v54 = vsel %vm972_vm5, %v1226_v51, -inf }
 0x490   : > { %1230 = vmax.xlane.f32.xlu1 %v1229_v54  ;;  %v1075_v55 = vsel %vm1007_vm6, %v1070_v53, 0 }
 0x491   : > { %1084 = vmatpush.bf16.msrb.mxu1 %v1075_v55 }
 0x494   : > { %3615 = vmatmul.msk.bf16.vlgmr.msrb.gmra.mxu1 %vm972_vm5, %v1065_v56  ;;  %v1227_v57 = vpop.f32.mrf.mxu3 }
 0x497   : > { %v1286_v0 = vpop.permute.xlu0 %1285 }
 0x498   : > { %v1291_v19 = vsel %vm972_vm5, %v1286_v0, 0 }
 0x49f   : > { %v1363_v11 = vpop.permute.xlu0 %1362 }
 0x4a0   : > { %v1368_v14 = vsel %vm972_vm5, %v1363_v11, 0 }
 0x4a1   : > { %1164 = vrot.lane.b32.xlu2 %v5093_v40, %s4766_s26 }
 0x4a7   : > { %v1361_v46 = vpop.permute.xlu0 %1360 }
 0x4a9   : > { %1283 = vrot.lane.b32.xlu2 %v5057_v58, %s4767_s22 }
 0x4fc   : > { %v1160_v2 = vpop.xlane.xlu2 %1159 }
 0x4fd   : > { %4643 = vrcp.f32 %v1160_v2 }
 0x503   : > { %v4644_v4 = vpop.eup %4643  ;;  %v1231_v5 = vpop.xlane.xlu1 %1230 }
 0x504   : > { %v1162_v6 = vmul.f32 %v4644_v4, %v4640_v47  ;;  %v1232_v7 = vsub.f32 %v1226_v51, %v1231_v5  ;;  %v1165_v8 = vpop.permute.xlu2 %1164 }
 0x505   : > { %v1170_v58 = vsel %vm1007_vm6, %v1165_v8, 0 }
 0x506   : > { %v1163_v12 = vpack.c.bf16 %v1162_v6, %v1162_v6  ;;  %v1233_v13 = vmul.f32 1.442695, %v1232_v7  ;;  %1179 = vmatpush.bf16.msra.mxu1 %v1170_v58 }
 0x508   : > { %4645 = vpow2.f32 %v1233_v13 }
 0x509   : > { %3619 = vmatmul.msk.bf16.vlgmr.msra.gmra.mxu1 %vm972_vm5, %v1163_v12 }
 0x50a   : > { %1276 = vmatpush.bf16.msrb.mxu1 %v1267_v10 }
 0x50c   : > { %v1284_v27 = vpop.permute.xlu2 %1283 }
 0x50e   : > { %1377 = vmatpush.bf16.xpose.msra.mxu1 %v1368_v14  ;;  %v4646_v15 = vpop.eup %4645  ;;  %v967_v14 = vld [vmem:[%s4984_s0 + $0x10] sm:$0xf] }
 0x50f   : > { %v1235_v16 = vsel %vm972_vm5, %v4646_v15, 0.0 }
 0x510   : > { %1236 = vadd.xlane.f32.xlu1 %v1235_v16 }
 0x511   : > { %v1086_v17 = vpop.f32.mrf.mxu1 }
 0x512   : > { %v1090_v18 = vpack.c.bf16 %v1086_v17, %v1086_v17 }
 0x514   : > { %3616 = vmatmul.msk.bf16.vlgmr.msrb.gmra.mxu2 %vm972_vm5, %v1090_v18 }
 0x515   : > { %1300 = vmatpush.bf16.xpose.msrb.mxu2 %v1291_v19 }
 0x519   : > { %v1088_v20 = vpop.f32.mrf.mxu1 }
 0x529   : > { %1241 = vrot.lane.b32.xlu1 %v5093_v40, %s4764_s25 }
 0x583   : > { %v1237_v23 = vpop.xlane.xlu1 %1236 }
 0x584   : > { %4647 = vrcp.f32 %v1237_v23 }
 0x586   : > { %v1181_v21 = vpop.f32.mrf.mxu1 }
 0x587   : > { %v1185_v22 = vpack.c.bf16 %v1181_v21, %v1181_v21 }
 0x589   : > { %3620 = vmatmul.msk.bf16.vlgmr.msra.gmra.mxu2 %vm972_vm5, %v1185_v22 }
 0x58a   : > { %v4648_v25 = vpop.eup %4647 }
 0x58b   : > { %v1239_v28 = vmul.f32 %v4648_v25, %v4646_v15  ;;  %v1344_v15 = vsel %vm1007_vm6, %v967_v14, 0  ;;  %v3776_v14 = vld [vmem:[%s4996_s4 + $0x110] sm:$0xf] }
 0x58d   : > { %v1240_v31 = vpack.c.bf16 %v1239_v28, %v1239_v28 }
 0x58e   : > { %v1183_v24 = vpop.f32.mrf.mxu1 }
 0x597   : > { %v1106_v26 = vpop.f32.mrf.mxu2 }
 0x598   : > { %v1126_v33 = vadd.f32 %v5103_v41, %v1106_v26 }
 0x599   : > { %3624 = vmatmul.msk.bf16.vlgmr.msrb.gmra.mxu2 %vm972_vm5, %v1284_v27  ;;  %v4623_v27 = vld [vmem:[%s5619_s13] ss:$0 sm:$0xff] }
 0x59b   : > { %v1242_v29 = vpop.permute.xlu1 %1241 }
 0x59c   : > { %v1247_v30 = vsel %vm1007_vm6, %v1242_v29, 0 }
 0x59d   : > { %1256 = vmatpush.bf16.msrb.mxu0 %v1247_v30 }
 0x59f   : > { %v1108_v32 = vpop.f32.mrf.mxu2 }
 0x5a0   : > { %3622 = vmatmul.msk.bf16.vlgmr.msrb.gmra.mxu0 %vm972_vm5, %v1240_v31 }
 0x5a1   : > { %1353 = vmatpush.bf16.msra.mxu0 %v1344_v15  ;;  %v4407_v15 = vld [vmem:[%s4996_s4 + $0x14c] sm:$0xf0] }
 0x60c   : > { %v1201_v34 = vpop.f32.mrf.mxu2 }
 0x60d   : > { %v1205_v35 = vadd.f32 %v1201_v34, %v1126_v33 }
 0x614   : > { %v1203_v36 = vpop.f32.mrf.mxu2 }
 0x615   : > { %v3760_v36 = vld [vmem:[%s4996_s4 + $0x100] sm:$0xf] }
 0x61c   : > { %v1302_v37 = vpop.f32.mrf.mxu2 }
 0x61d   : > { %v1303_v38 = vadd.f32 %v5072_v63, %v1302_v37  ;;  %v1258_v39 = vpop.f32.mrf.mxu0  ;;  %v4405_v37 = vld [vmem:[%s4996_s4 + $0x13c] sm:$0xf0] }
 0x61e   : > { %v1262_v42 = vpack.c.bf16 %v1258_v39, %v1258_v39  ;;  %v3761_v39 = vor.u32 %v4405_v37, %v3760_v36  ;;  %v4392_v36 = vld [vmem:[%s4996_s4 + $0xd4] sm:$0xf0] }
 0x61f   : > { %v1306_v43 = vsel %vm972_vm5, %v1303_v38, -inf }
 0x620   : > { %3623 = vmatmul.msk.bf16.vlgmr.msrb.gmra.mxu1 %vm972_vm5, %v1262_v42  ;;  %1307 = vmax.xlane.f32.xlu2 %v1306_v43  ;;  %v3762_v42 = vld [vmem:[%s4996_s4 + $0x140] sm:$0xf0]  ;;  %v3768_v43 = vld [vmem:[%s4996_s4 + $0x108] sm:$0xf] }
 0x621   : > { %1811 = vmatpush.bf16.msrb.mxu0 %v3761_v39  ;;  %v3722_v39 = vld [vmem:[%s4996_s4 + $0xd8] sm:$0xf0] }
 0x624   : > { %v1304_v44 = vpop.f32.mrf.mxu2 }
 0x625   : > { %v1260_v45 = vpop.f32.mrf.mxu0  ;;  %v4406_v44 = vld [vmem:[%s4996_s4 + $0x144] sm:$0xf0] }
 0x630   : > { %3627 = vmatmul.msk.bf16.vlgmr.msra.gmra.mxu1 %vm972_vm5, %v1361_v46  ;;  %v3769_v46 = vor.u32 %v4406_v44, %v3768_v43 }
 0x638   : > { %1395 = vrot.lane.b32.xlu2 %v5093_v40, %s4768_s16 }
 0x693   : > { %v1308_v41 = vpop.xlane.xlu2 %1307 }
 0x694   : > { %v1309_v52 = vsub.f32 %v1303_v38, %v1308_v41  ;;  %v4397_v38 = vld [vmem:[%s4996_s4 + $0x104] sm:$0xf]  ;;  %v4398_v41 = vld [vmem:[%s4996_s4 + $0x10c] sm:$0xf] }
 0x695   : > { %v3765_v45 = vor.u32 %v4397_v38, %v3762_v42  ;;  %v4384_v38 = vld [vmem:[%s4996_s4 + $0x9c] sm:$0xf]  ;;  %v3648_v42 = vld [vmem:[%s4996_s4 + $0x10] sm:$0xf] }
 0x696   : > { %v1310_v53 = vmul.f32 1.442695, %v1309_v52  ;;  %v4381_v52 = vld [vmem:[%s4996_s4 + $0x84] sm:$0xf]  ;;  %v3725_v44 = vor.u32 %v4384_v38, %v3722_v39 }
 0x697   : > { %1824 = vmatpush.bf16.msrb.mxu1 %v3765_v45  ;;  %v4375_v45 = vld [vmem:[%s4996_s4 + $0x4c] sm:$0xf0] }
 0x698   : > { %4649 = vpow2.f32 %v1310_v53 }
 0x69b   : > { %v1396_v47 = vpop.permute.xlu2 %1395 }
 0x69c   : > { %v1401_v48 = vsel %vm1007_vm6, %v1396_v47, 0  ;;  %v3770_v47 = vld [vmem:[%s4996_s4 + $0x148] sm:$0xf0] }
 0x69d   : > { %v1278_v49 = vpop.f32.mrf.mxu1  ;;  %1410 = vmatpush.bf16.msra.mxu2 %v1401_v48  ;;  %v3773_v48 = vor.u32 %v4398_v41, %v3770_v47  ;;  %v3649_v41 = vor.u32 %v4375_v45, %v3648_v42  ;;  %v3650_v47 = vld [vmem:[%s4996_s4 + $0x50] sm:$0xf0] }
 0x69e   : > { %v1282_v50 = vadd.f32 %v1278_v49, %v1205_v35  ;;  %v4650_v57 = vpop.eup %4649  ;;  %v4403_v45 = vld [vmem:[%s4996_s4 + $0x134] sm:$0xf] }
 0x69f   : > { %v1312_v60 = vsel %vm972_vm5, %v4650_v57, 0.0 }
 0x6a1   : > { %1837 = vmatpush.bf16.msrb.mxu2 %v3769_v46  ;;  %v4367_v46 = vld [vmem:[%s4996_s4 + $0x14] sm:$0xf] }
 0x6a5   : > { %v1280_v51 = vpop.f32.mrf.mxu1 }
 0x6a6   : > { %v4389_v51 = vld [vmem:[%s4996_s4 + $0xbc] sm:$0xf0] }
 0x6ad   : > { %v1379_v54 = vpop.f32.mrf.mxu1 }
 0x6ae   : > { %v1380_v55 = vadd.f32 %v5072_v63, %v1379_v54 }
 0x6b0   : > { %v1383_v56 = vsel %vm972_vm5, %v1380_v55, -inf }
 0x6b1   : > { %1384 = vmax.xlane.f32.xlu1 %v1383_v56  ;;  %v3704_v56 = vld [vmem:[%s4996_s4 + $0x88] sm:$0xf] }
 0x6b5   : > { %v1381_v59 = vpop.f32.mrf.mxu1 }
 0x6b6   : > { %v4390_v59 = vld [vmem:[%s4996_s4 + $0xc4] sm:$0xf0] }
 0x6b9   : > { %1313 = vadd.xlane.f32.xlu1 %v1312_v60  ;;  %v4382_v60 = vld [vmem:[%s4996_s4 + $0x8c] sm:$0xf] }
 0x724   : > { %v1385_v61 = vpop.xlane.xlu1 %1384 }
 0x725   : > { %v1386_v62 = vsub.f32 %v1380_v55, %v1385_v61  ;;  %v3698_v55 = vld [vmem:[%s4996_s4 + $0xc0] sm:$0xf0]  ;;  %v3706_v61 = vld [vmem:[%s4996_s4 + $0xc8] sm:$0xf0] }
 0x727   : > { %v1387_v0 = vmul.f32 1.442695, %v1386_v62  ;;  %v3705_v62 = vor.u32 %v4390_v59, %v3704_v56 }
 0x729   : > { %4651 = vpow2.f32 %v1387_v0  ;;  %v3709_v0 = vor.u32 %v4382_v60, %v3706_v61  ;;  %1838 = vmatpush.bf16.msrb.mxu2 %v3705_v62 }
 0x72c   : > { %v1314_v4 = vpop.xlane.xlu1 %1313 }
 0x72f   : > { %v4652_v2 = vpop.eup %4651 }
 0x730   : > { %v1389_v3 = vsel %vm972_vm5, %v4652_v2, 0.0 }
 0x731   : > { %1390 = vadd.xlane.f32.xlu0 %v1389_v3  ;;  %v4373_v3 = vld [vmem:[%s4996_s4 + $0x3c] sm:$0xf0] }
 0x745   : > { %1318 = vrot.lane.b32.xlu0 %v5093_v40, %s4767_s22  ;;  %v968_v40 = vld [vmem:[%s4984_s0 + $0x14] sm:$0xf] }
 0x746   : > { %v1421_v13 = vsel %vm1007_vm6, %v968_v40, 0 }
 0x7a4   : > { %v1391_v63 = vpop.xlane.xlu0 %1390 }
 0x7a5   : > { %4653 = vrcp.f32 %v1391_v63  ;;  %v4365_v63 = vld [vmem:[%s4996_s4 + $0x4] sm:$0xf] }
 0x7a6   : > { %4655 = vrcp.f32 %v1314_v4 }
 0x7ab   : > { %v4654_v5 = vpop.eup %4653 }
 0x7ac   : > { %v1393_v6 = vmul.f32 %v4654_v5, %v4652_v2  ;;  %v4656_v8 = vpop.eup %4655  ;;  %v3632_v2 = vld [vmem:[%s4996_s4] sm:$0xf]  ;;  %v3634_v5 = vld [vmem:[%s4996_s4 + $0x40] sm:$0xf0] }
 0x7ad   : > { %v1316_v10 = vmul.f32 %v4656_v8, %v4650_v57  ;;  %v3701_v57 = vor.u32 %v4381_v52, %v3698_v55  ;;  %v3633_v4 = vor.u32 %v4373_v3, %v3632_v2  ;;  %v3637_v8 = vor.u32 %v4365_v63, %v3634_v5  ;;  %v3658_v55 = vld [vmem:[%s4996_s4 + $0x58] sm:$0xf0]  ;;  %v4409_v5 = vld [vmem:[%s4996_s4 + $0x15c] sm:$0xf0] }
 0x7ae   : > { %v1394_v7 = vpack.c.bf16 %v1393_v6, %v1393_v6  ;;  %v3640_v6 = vld [vmem:[%s4996_s4 + $0x8] sm:$0xf] }
 0x7af   : > { %v1317_v12 = vpack.c.bf16 %v1316_v10, %v1316_v10  ;;  %1825 = vmatpush.bf16.msrb.mxu1 %v3701_v57 }
 0x7b0   : > { %3628 = vmatmul.msk.bf16.vlgmr.msra.gmra.mxu2 %vm972_vm5, %v1394_v7  ;;  %v4374_v7 = vld [vmem:[%s4996_s4 + $0x44] sm:$0xf0] }
 0x7b1   : > { %v3641_v10 = vor.u32 %v4374_v7, %v3640_v6  ;;  %v4401_v6 = vld [vmem:[%s4996_s4 + $0x124] sm:$0xf] }
 0x7b2   : > { %v3794_v7 = vld [vmem:[%s4996_s4 + $0x160] sm:$0xf0] }
 0x7b3   : > { %1826 = vmatpush.bf16.msrb.mxu1 %v3637_v8  ;;  %1839 = vmatpush.bf16.msrb.mxu2 %v3641_v10  ;;  %v3800_v8 = vld [vmem:[%s4996_s4 + $0x128] sm:$0xf] }
 0x7b7   : > { %v1319_v58 = vpop.permute.xlu0 %1318 }
 0x7b8   : > { %v1324_v11 = vsel %vm1007_vm6, %v1319_v58, 0  ;;  %v4366_v58 = vld [vmem:[%s4996_s4 + $0xc] sm:$0xf] }
 0x7b9   : > { %1333 = vmatpush.bf16.msra.mxu3 %v1324_v11  ;;  %v3642_v11 = vld [vmem:[%s4996_s4 + $0x48] sm:$0xf0] }
 0x7bc   : > { %3625 = vmatmul.msk.bf16.vlgmr.msra.gmra.mxu3 %vm972_vm5, %v1317_v12  ;;  %v3645_v12 = vor.u32 %v4366_v58, %v3642_v11  ;;  %v4410_v58 = vld [vmem:[%s4996_s4 + $0x164] sm:$0xf0]  ;;  %v4402_v11 = vld [vmem:[%s4996_s4 + $0x12c] sm:$0xf] }
 0x7bd   : > { %1430 = vmatpush.bf16.msrb.mxu3 %v1421_v13 }
 0x7c1   : > { %1850 = vmatpush.bf16.msra.mxu3 %v3773_v48  ;;  %v3656_v48 = vld [vmem:[%s4996_s4 + $0x18] sm:$0xf] }
 0x7c5   : > { %1851 = vmatpush.bf16.msra.mxu3 %v3709_v0  ;;  %v4624_v0 = vld [vmem:[%s5621_s8] ss:$0 sm:$0xff] }
 0x7c9   : > { %1852 = vmatpush.bf16.msra.mxu3 %v3645_v12  ;;  %v3802_v12 = vld [vmem:[%s4996_s4 + $0x168] sm:$0xf0] }
 0x833   : > { %v1412_v16 = vpop.f32.mrf.mxu2 }
 0x834   : > { %v1416_v17 = vpack.c.bf16 %v1412_v16, %v1412_v16  ;;  %v4399_v16 = vld [vmem:[%s4996_s4 + $0x114] sm:$0xf] }
 0x836   : > { %3629 = vmatmul.msk.bf16.vlgmr.msrb.gmra.mxu3 %vm972_vm5, %v1416_v17  ;;  %v3777_v17 = vor.u32 %v4407_v15, %v3776_v14  ;;  %v3728_v14 = vld [vmem:[%s4996_s4 + $0xa0] sm:$0xf] }
 0x837   : > { %v4393_v15 = vld [vmem:[%s4996_s4 + $0xdc] sm:$0xf0] }
 0x83b   : > { %v1414_v18 = vpop.f32.mrf.mxu2 }
 0x83c   : > { %v3778_v18 = vld [vmem:[%s4996_s4 + $0x150] sm:$0xf0] }
 0x83f   : > { %v1335_v19 = vpop.f32.mrf.mxu3 }
 0x840   : > { %v1339_v20 = vpack.c.bf16 %v1335_v19, %v1335_v19  ;;  %v3784_v19 = vld [vmem:[%s4996_s4 + $0x118] sm:$0xf] }
 0x842   : > { %3626 = vmatmul.msk.bf16.vlgmr.msra.gmra.mxu0 %vm972_vm5, %v1339_v20  ;;  %v4408_v20 = vld [vmem:[%s4996_s4 + $0x154] sm:$0xf0] }
 0x847   : > { %v1337_v21 = vpop.f32.mrf.mxu3 }
 0x8b9   : > { %v1432_v22 = vpop.f32.mrf.mxu3 }
 0x8bf   : > { %v1355_v23 = vpop.f32.mrf.mxu0 }
 0x8c0   : > { %v1359_v24 = vadd.f32 %v1355_v23, %v1282_v50  ;;  %v3696_v50 = vld [vmem:[%s4996_s4 + $0x80] sm:$0xf]  ;;  %v3785_v23 = vor.u32 %v4408_v20, %v3784_v19  ;;  %v3730_v19 = vld [vmem:[%s4996_s4 + $0xe0] sm:$0xf0]  ;;  %v3736_v20 = vld [vmem:[%s4996_s4 + $0xa8] sm:$0xf] }
 0x8c1   : > { %v1434_v25 = vpop.f32.mrf.mxu3  ;;  %v3697_v54 = vor.u32 %v4389_v51, %v3696_v50  ;;  %v3653_v51 = vor.u32 %v4367_v46, %v3650_v47  ;;  %v3810_v46 = vld [vmem:[%s4996_s4 + $0x170] sm:$0xf0]  ;;  %v4412_v47 = vld [vmem:[%s4996_s4 + $0x174] sm:$0xf0] }
 0x8c2   : > { %v1436_v26 = vadd.f32 %v1432_v22, %v1359_v24  ;;  %v3781_v22 = vor.u32 %v4399_v16, %v3778_v18  ;;  %v4400_v24 = vld [vmem:[%s4996_s4 + $0x11c] sm:$0xf]  ;;  %1889 = vmatpush.bf16.msra.mxu2 %v3785_v23  ;;  %v3801_v16 = vor.u32 %v4410_v58, %v3800_v8  ;;  %v4385_v18 = vld [vmem:[%s4996_s4 + $0xa4] sm:$0xf]  ;;  %v3738_v23 = vld [vmem:[%s4996_s4 + $0xe8] sm:$0xf0] }
 0x8c3   : > { %1812 = vmatpush.bf16.msrb.mxu0 %v3697_v54  ;;  %v3786_v25 = vld [vmem:[%s4996_s4 + $0x158] sm:$0xf0]  ;;  %v3688_v8 = vld [vmem:[%s4996_s4 + $0x38] sm:$0xf] }
 0x8c4   : > { %v1437_v28 = vadd.f32 %v1436_v26, %v5014_v1  ;;  %v3712_v26 = vld [vmem:[%s4996_s4 + $0x90] sm:$0xf]  ;;  %1876 = vmatpush.bf16.msra.mxu1 %v3781_v22  ;;  %v4368_v54 = vld [vmem:[%s4996_s4 + $0x1c] sm:$0xf]  ;;  %v4386_v22 = vld [vmem:[%s4996_s4 + $0xac] sm:$0xf] }
 0x8c5   : > { %v3661_v56 = vor.u32 %v4368_v54, %v3658_v55  ;;  %v4395_v54 = vld [vmem:[%s4996_s4 + $0xec] sm:$0xf0]  ;;  %v4372_v58 = vld [vmem:[%s4996_s4 + $0x3c] sm:$0xf] }
 0x8c6   : > { %v5161_v29 = vadd.f32 %v4623_v27, %v1437_v28  ;;  %v3789_v27 = vor.u32 %v4400_v24, %v3786_v25  ;;  %v4391_v28 = vld [vmem:[%s4996_s4 + $0xcc] sm:$0xf0]  ;;  %v3729_v24 = vor.u32 %v4393_v15, %v3728_v14  ;;  %v3733_v25 = vor.u32 %v4385_v18, %v3730_v19  ;;  %v4420_v15 = vld [vmem:[%s5006_s7 + $0x38] sm:$0xff] }
 0x8c7   : > { %v1357_v30 = vpop.f32.mrf.mxu0  ;;  %1813 = vmatpush.bf16.msrb.mxu0 %v3633_v4  ;;  %v3792_v4 = vld [vmem:[%s4996_s4 + $0x120] sm:$0xf]  ;;  %v4444_v18 = vld [vmem:[%s5006_s7 + $0xf8] sm:$0xff]  ;;  %v4419_v19 = vld [vmem:[%s5006_s7 + $0x30] sm:$0xff] }
 0x8c8   : > { %v1445_v31 = vsel %vm803_vm1, %v5161_v29, 0.0  ;;  %v4383_v30 = vld [vmem:[%s4996_s4 + $0x94] sm:$0xf]  ;;  %1902 = vmatpush.bf16.msrb.mxu3 %v3789_v27  ;;  %v4377_v27 = vld [vmem:[%s4996_s4 + $0x5c] sm:$0xf0] }
 0x8c9   : > { %1446 = vadd.xlane.f32.xlu1 %v1445_v31  ;;  %v3714_v31 = vld [vmem:[%s4996_s4 + $0xd0] sm:$0xf0] }
 0x8cb   : > { %1863 = vmatpush.bf16.msra.mxu0 %v3777_v17  ;;  %v3805_v17 = vor.u32 %v4402_v11, %v3802_v12  ;;  %v3690_v11 = vld [vmem:[%s4996_s4 + $0x78] sm:$0xf0] }
 0x8cc   : > { %1903 = vmatpush.bf16.msrb.mxu3 %v3725_v44  ;;  %v4411_v44 = vld [vmem:[%s4996_s4 + $0x16c] sm:$0xf0]  ;;  %v3693_v14 = vor.u32 %v4372_v58, %v3690_v11 }
 0x8cd   : > { %v4463_v58 = vld [vmem:[%s5006_s7 + $0x190] sm:$0xff] }
 0x8ce   : > { %v4471_v11 = vld [vmem:[%s5006_s7 + $0x1d0] sm:$0xff] }
 0x8d0   : > { %1904 = vmatpush.bf16.msrb.mxu3 %v3661_v56 }
 0x93c   : > { %v1447_v32 = vpop.xlane.xlu1 %1446 }
 0x93d   : > { %v1448_v33 = vmul.f32 %v1447_v32, %v5018_v9 }
 0x93f   : > { %v5167_v34 = vsub.f32 %v5161_v29, %v1448_v33  ;;  %v3713_v33 = vor.u32 %v4391_v28, %v3712_v26  ;;  %v3664_v26 = vld [vmem:[%s4996_s4 + $0x20] sm:$0xf] }
 0x941   : > { %v1450_v1 = vmul.f32 %v5167_v34, %v5167_v34  ;;  %1864 = vmatpush.bf16.msra.mxu0 %v3713_v33  ;;  %v3672_v33 = vld [vmem:[%s4996_s4 + $0x28] sm:$0xf] }
 0x943   : > { %v1451_v35 = vsel %vm803_vm1, %v1450_v1, 0.0  ;;  %v3717_v1 = vor.u32 %v4383_v30, %v3714_v31  ;;  %v3741_v30 = vor.u32 %v4386_v22, %v3738_v23  ;;  %v4369_v31 = vld [vmem:[%s4996_s4 + $0x24] sm:$0xf]  ;;  %v4443_v22 = vld [vmem:[%s5006_s7 + $0xf0] sm:$0xff]  ;;  %v4418_v23 = vld [vmem:[%s5006_s7 + $0x28] sm:$0xff] }
 0x944   : > { %1452 = vadd.xlane.f32.xlu1 %v1451_v35  ;;  %v3720_v35 = vld [vmem:[%s4996_s4 + $0x98] sm:$0xf] }
 0x945   : > { %v3721_v37 = vor.u32 %v4392_v36, %v3720_v35  ;;  %1877 = vmatpush.bf16.msra.mxu1 %v3717_v1  ;;  %1865 = vmatpush.bf16.msra.mxu0 %v3649_v41  ;;  %v4378_v1 = vld [vmem:[%s4996_s4 + $0x64] sm:$0xf0]  ;;  %v4370_v35 = vld [vmem:[%s4996_s4 + $0x2c] sm:$0xf]  ;;  %v3816_v41 = vld [vmem:[%s4996_s4 + $0x138] sm:$0xf] }
 0x946   : > { %v3674_v36 = vld [vmem:[%s4996_s4 + $0x68] sm:$0xf0]  ;;  %v3673_v39 = vor.u32 %v4378_v1, %v3672_v33  ;;  %v3817_v55 = vor.u32 %v4412_v47, %v3816_v41  ;;  %v4424_v33 = vld [vmem:[%s5006_s7 + $0x58] sm:$0xff] }
 0x947   : > { %1890 = vmatpush.bf16.msra.mxu2 %v3721_v37  ;;  %v3665_v37 = vor.u32 %v4377_v27, %v3664_v26  ;;  %v3677_v42 = vor.u32 %v4370_v35, %v3674_v36  ;;  %v4442_v26 = vld [vmem:[%s5006_s7 + $0xe8] sm:$0xff]  ;;  %v4417_v27 = vld [vmem:[%s5006_s7 + $0x20] sm:$0xff]  ;;  %v4432_v1 = vld [vmem:[%s5006_s7 + $0x98] sm:$0xff] }
 0x948   : > { %v4440_v35 = vld [vmem:[%s5006_s7 + $0xd8] sm:$0xff]  ;;  %v4415_v36 = vld [vmem:[%s5006_s7 + $0x10] sm:$0xff] }
 0x949   : > { %1878 = vmatpush.bf16.msra.mxu1 %v3653_v51  ;;  %v3813_v51 = vor.u32 %v4403_v45, %v3810_v46  ;;  %v4413_v45 = vld [vmem:[%s5006_s7] sm:$0xff]  ;;  %v4452_v41 = vld [vmem:[%s5006_s7 + $0x138] sm:$0xff] }
 0x94a   : > { %v4421_v46 = vld [vmem:[%s5006_s7 + $0x40] sm:$0xff]  ;;  %v4460_v47 = vld [vmem:[%s5006_s7 + $0x178] sm:$0xff] }
 0x9b7   : > { %v1453_v49 = vpop.xlane.xlu1 %1452 }
 0x9b8   : > { %v5183_v53 = vmul.f32 0.021276595, %v1453_v49  ;;  %v4376_v49 = vld [vmem:[%s4996_s4 + $0x54] sm:$0xf0] }
 0x9b9   : > { %v3657_v52 = vor.u32 %v4376_v49, %v3656_v48  ;;  %v4404_v48 = vld [vmem:[%s4996_s4 + $0x13c] sm:$0xf] }
 0x9ba   : > { %4657 = vrsqrt.f32 %v5183_v53  ;;  %vm1462_vm7 = vcmp.eq.f32.partialorder %v5183_v53, inf  ;;  %v1465_v59 = vand.u32 2147483648, %v5183_v53  ;;  %vm1464_vm8 = vcmp.eq.f32.partialorder %v5183_v53, 0.0  ;;  %v3818_v49 = vld [vmem:[%s4996_s4 + $0x178] sm:$0xf0] }
 0x9bb   : > { %1891 = vmatpush.bf16.msra.mxu2 %v3657_v52  ;;  %v3744_v52 = vld [vmem:[%s4996_s4 + $0xb0] sm:$0xf]  ;;  %v3821_v56 = vor.u32 %v4404_v48, %v3818_v49  ;;  %v4429_v48 = vld [vmem:[%s5006_s7 + $0x80] sm:$0xff] }
 0x9bc   : > { %v4437_v49 = vld [vmem:[%s5006_s7 + $0xc0] sm:$0xff] }
 0x9c0   : > { %v4658_v40 = vpop.eup %4657 }
 0x9c1   : > { %v1456_v13 = vmul.f32 %v4658_v40, %v5183_v53 }
 0x9c3   : > { %v1457_v21 = vmul.f32 %v4658_v40, %v1456_v13  ;;  %v3793_v13 = vor.u32 %v4409_v5, %v3792_v4 }
 0x9c5   : > { %v1458_v32 = vmul.f32 0.5, %v1457_v21  ;;  %v4394_v21 = vld [vmem:[%s4996_s4 + $0xe4] sm:$0xf0] }
 0x9c6   : > { %v3737_v28 = vor.u32 %v4394_v21, %v3736_v20  ;;  %v4427_v20 = vld [vmem:[%s5006_s7 + $0x70] sm:$0xff] }
 0x9c7   : > { %v1459_v43 = vsub.f32 1.5, %v1458_v32  ;;  %v3666_v32 = vld [vmem:[%s4996_s4 + $0x60] sm:$0xf0]  ;;  %v4435_v21 = vld [vmem:[%s5006_s7 + $0xb0] sm:$0xff] }
 0x9c8   : > { %v3669_v38 = vor.u32 %v4369_v31, %v3666_v32  ;;  %v4441_v31 = vld [vmem:[%s5006_s7 + $0xe0] sm:$0xff]  ;;  %v4416_v32 = vld [vmem:[%s5006_s7 + $0x18] sm:$0xff] }
 0x9c9   : > { %v1460_v50 = vmul.f32 %v4658_v40, %v1459_v43  ;;  %v3808_v43 = vld [vmem:[%s4996_s4 + $0x130] sm:$0xf] }
 0x9cb   : > { %v1461_v57 = vmul.f32 %v1460_v50, %v5183_v53  ;;  %v3809_v50 = vor.u32 %v4411_v44, %v3808_v43  ;;  %v4430_v43 = vld [vmem:[%s5006_s7 + $0x88] sm:$0xff] }
 0x9cc   : > { %v4438_v44 = vld [vmem:[%s5006_s7 + $0xc8] sm:$0xff] }
 0x9cd   : > { %v1463_v60 = vsel %vm1462_vm7, %v5183_v53, %v1461_v57  ;;  %v4625_v53 = vld [vmem:[%s5623_s20] ss:$0 sm:$0xff]  ;;  %v4387_v57 = vld [vmem:[%s4996_s4 + $0xb4] sm:$0xf] }
 0x9ce   : > { %v1466_v61 = vsel %vm1464_vm8, %v1465_v59, %v1463_v60  ;;  %v3746_v59 = vld [vmem:[%s4996_s4 + $0xf0] sm:$0xf0]  ;;  %v3752_v60 = vld [vmem:[%s4996_s4 + $0xb8] sm:$0xf] }
 0x9cf   : > { %v1467_v62 = vadd.f32 1e-06, %v1466_v61  ;;  %v4396_v61 = vld [vmem:[%s4996_s4 + $0xf4] sm:$0xf0] }
 0x9d0   : > { %v3753_v4 = vor.u32 %v4396_v61, %v3752_v60  ;;  %v4466_v60 = vld [vmem:[%s5006_s7 + $0x1a8] sm:$0xff] }
 0x9d1   : > { %4659 = vrcp.f32 %v1467_v62  ;;  %v4388_v62 = vld [vmem:[%s4996_s4 + $0xbc] sm:$0xf]  ;;  %v4474_v61 = vld [vmem:[%s5006_s7 + $0x1e8] sm:$0xff] }
 0x9d7   : > { %v4660_v2 = vpop.eup %4659 }
 0x9d8   : > { %v1469_v3 = vmul.f32 %v4660_v2, %v5167_v34  ;;  %v3797_v34 = vor.u32 %v4401_v6, %v3794_v7  ;;  %v3745_v2 = vor.u32 %v4395_v54, %v3744_v52  ;;  %v4371_v6 = vld [vmem:[%s4996_s4 + $0x34] sm:$0xf] }
 0x9d9   : > { %v3682_v7 = vld [vmem:[%s4996_s4 + $0x70] sm:$0xf0] }
 0x9da   : > { %v1473_v63 = vmul.f32 %v4624_v0, %v1469_v3  ;;  %v3754_v0 = vld [vmem:[%s4996_s4 + $0xf8] sm:$0xf0]  ;;  %v3680_v3 = vld [vmem:[%s4996_s4 + $0x30] sm:$0xf] }
 0x9db   : > { %v3757_v5 = vor.u32 %v4388_v62, %v3754_v0  ;;  %v4451_v52 = vld [vmem:[%s5006_s7 + $0x130] sm:$0xff]  ;;  %v4449_v62 = vld [vmem:[%s5006_s7 + $0x120] sm:$0xff] }
 0x9dc   : > { %v1477_v10 = vadd.f32 %v4625_v53, %v1473_v63  ;;  %v3749_v53 = vor.u32 %v4387_v57, %v3746_v59  ;;  %v4379_v63 = vld [vmem:[%s4996_s4 + $0x6c] sm:$0xf0]  ;;  %v4450_v57 = vld [vmem:[%s5006_s7 + $0x128] sm:$0xff]  ;;  %v4457_v0 = vld [vmem:[%s5006_s7 + $0x160] sm:$0xff] }
 0x9dd   : > { %v3681_v12 = vor.u32 %v4379_v63, %v3680_v3  ;;  %v4459_v54 = vld [vmem:[%s5006_s7 + $0x170] sm:$0xff]  ;;  %v4458_v59 = vld [vmem:[%s5006_s7 + $0x168] sm:$0xff]  ;;  %v4448_v3 = vld [vmem:[%s5006_s7 + $0x118] sm:$0xff] }
 0x9de   : > { %v5248_v40 = vpack.c.bf16 %v1477_v10, %v1477_v10  ;;  %v4380_v10 = vld [vmem:[%s4996_s4 + $0x74] sm:$0xf0] }
 0x9df   : > { %v4456_v63 = vld [vmem:[%s5006_s7 + $0x158] sm:$0xff] }
 0x9e0   : > { %3822 = vmatmul.msk.bf16.vlgmr.msrb.gmra.mxu0 %vm803_vm1, %v5248_v40  ;;  %3823 = vmatmul.msk.bf16.vlgmr.msrb.gmra.mxu1 %vm803_vm1, %v5248_v40 }
 0x9e1   : > { %3824 = vmatmul.msk.bf16.vlgmr.msrb.gmra.mxu2 %vm803_vm1, %v5248_v40  ;;  %3825 = vmatmul.msk.bf16.vlgmr.msra.gmra.mxu3 %vm803_vm1, %v5248_v40 }
 0x9e2   : > { %1915 = vmatpush.bf16.msrb.mxu0 %v3793_v13  ;;  %1928 = vmatpush.bf16.msrb.mxu1 %v3797_v34  ;;  %v3685_v13 = vor.u32 %v4371_v6, %v3682_v7  ;;  %v3689_v34 = vor.u32 %v4380_v10, %v3688_v8  ;;  %v4464_v6 = vld [vmem:[%s5006_s7 + $0x198] sm:$0xff]  ;;  %v4446_v8 = vld [vmem:[%s5006_s7 + $0x108] sm:$0xff] }
 0x9e3   : > { %1941 = vmatpush.bf16.msrb.mxu2 %v3801_v16  ;;  %1954 = vmatpush.bf16.msra.mxu3 %v3805_v17  ;;  %v4428_v16 = vld [vmem:[%s5006_s7 + $0x78] sm:$0xff]  ;;  %v4454_v10 = vld [vmem:[%s5006_s7 + $0x148] sm:$0xff] }
 0x9e4   : > { %v4436_v17 = vld [vmem:[%s5006_s7 + $0xb8] sm:$0xff] }
 0x9e5   : > { %v4472_v7 = vld [vmem:[%s5006_s7 + $0x1d8] sm:$0xff] }
 0x9e6   : > { %1916 = vmatpush.bf16.msrb.mxu0 %v3729_v24  ;;  %1929 = vmatpush.bf16.msrb.mxu1 %v3733_v25  ;;  %v4426_v24 = vld [vmem:[%s5006_s7 + $0x68] sm:$0xff] }
 0x9e7   : > { %1942 = vmatpush.bf16.msrb.mxu2 %v3737_v28  ;;  %1955 = vmatpush.bf16.msra.mxu3 %v3741_v30  ;;  %v4434_v25 = vld [vmem:[%s5006_s7 + $0xa8] sm:$0xff]  ;;  %v4425_v28 = vld [vmem:[%s5006_s7 + $0x60] sm:$0xff] }
 0x9e8   : > { %v4433_v30 = vld [vmem:[%s5006_s7 + $0xa0] sm:$0xff] }
 0x9ea   : > { %1917 = vmatpush.bf16.msrb.mxu0 %v3665_v37  ;;  %1930 = vmatpush.bf16.msrb.mxu1 %v3669_v38  ;;  %v4423_v37 = vld [vmem:[%s5006_s7 + $0x50] sm:$0xff] }
 0x9eb   : > { %1943 = vmatpush.bf16.msrb.mxu2 %v3673_v39  ;;  %1956 = vmatpush.bf16.msra.mxu3 %v3677_v42  ;;  %v4431_v38 = vld [vmem:[%s5006_s7 + $0x90] sm:$0xff]  ;;  %v4414_v42 = vld [vmem:[%s5006_s7 + $0x8] sm:$0xff] }
 0x9ec   : > { %v4439_v39 = vld [vmem:[%s5006_s7 + $0xd0] sm:$0xff] }
 0x9f0   : > { %3826 = vmatmul.msk.bf16.vlgmr.msra.gmra.mxu0 %vm803_vm1, %v5248_v40  ;;  %3827 = vmatmul.msk.bf16.vlgmr.msra.gmra.mxu1 %vm803_vm1, %v5248_v40 }
 0x9f1   : > { %3828 = vmatmul.msk.bf16.vlgmr.msra.gmra.mxu2 %vm803_vm1, %v5248_v40  ;;  %3829 = vmatmul.msk.bf16.vlgmr.msrb.gmra.mxu3 %vm803_vm1, %v5248_v40 }
 0x9f2   : > { %1967 = vmatpush.bf16.msra.mxu0 %v3809_v50  ;;  %1980 = vmatpush.bf16.msra.mxu1 %v3813_v51  ;;  %v4468_v50 = vld [vmem:[%s5006_s7 + $0x1b8] sm:$0xff] }
 0x9f3   : > { %1993 = vmatpush.bf16.msra.mxu2 %v3817_v55  ;;  %2006 = vmatpush.bf16.msrb.mxu3 %v3821_v56  ;;  %v4476_v51 = vld [vmem:[%s5006_s7 + $0x1f8] sm:$0xff]  ;;  %v4467_v55 = vld [vmem:[%s5006_s7 + $0x1b0] sm:$0xff] }
 0x9f4   : > { %v4475_v56 = vld [vmem:[%s5006_s7 + $0x1f0] sm:$0xff] }
 0x9f6   : > { %1968 = vmatpush.bf16.msra.mxu0 %v3745_v2  ;;  %1981 = vmatpush.bf16.msra.mxu1 %v3749_v53  ;;  %v4465_v2 = vld [vmem:[%s5006_s7 + $0x1a0] sm:$0xff] }
 0x9f7   : > { %1994 = vmatpush.bf16.msra.mxu2 %v3753_v4  ;;  %2007 = vmatpush.bf16.msrb.mxu3 %v3757_v5  ;;  %v4473_v53 = vld [vmem:[%s5006_s7 + $0x1e0] sm:$0xff]  ;;  %v4447_v4 = vld [vmem:[%s5006_s7 + $0x110] sm:$0xff] }
 0x9f8   : > { %v4455_v5 = vld [vmem:[%s5006_s7 + $0x150] sm:$0xff] }
 0x9fa   : > { %1969 = vmatpush.bf16.msra.mxu0 %v3681_v12  ;;  %1982 = vmatpush.bf16.msra.mxu1 %v3685_v13  ;;  %v4445_v12 = vld [vmem:[%s5006_s7 + $0x100] sm:$0xff] }
 0x9fb   : > { %1995 = vmatpush.bf16.msra.mxu2 %v3689_v34  ;;  %2008 = vmatpush.bf16.msrb.mxu3 %v3693_v14  ;;  %v4453_v13 = vld [vmem:[%s5006_s7 + $0x140] sm:$0xff]  ;;  %v4462_v34 = vld [vmem:[%s5006_s7 + $0x188] sm:$0xff] }
 0x9fc   : > { %v4470_v14 = vld [vmem:[%s5006_s7 + $0x1c8] sm:$0xff] }
 0xa00   : > { %3830 = vmatmul.msk.bf16.vlgmr.msrb.gmra.mxu0 %vm803_vm1, %v5248_v40  ;;  %3831 = vmatmul.msk.bf16.vlgmr.msrb.gmra.mxu1 %vm803_vm1, %v5248_v40 }
 0xa01   : > { %3832 = vmatmul.msk.bf16.vlgmr.msrb.gmra.mxu2 %vm803_vm1, %v5248_v40  ;;  %3833 = vmatmul.msk.bf16.vlgmr.msra.gmra.mxu3 %vm803_vm1, %v5248_v40 }
 0xa02   : > { %3074 = vmatpush.bf16.msrb.mxu0 %v4420_v15  ;;  %3087 = vmatpush.bf16.msrb.mxu1 %v4428_v16  ;;  %v4461_v15 = vld [vmem:[%s5006_s7 + $0x180] sm:$0xff] }
 0xa03   : > { %3100 = vmatpush.bf16.msrb.mxu2 %v4436_v17  ;;  %3113 = vmatpush.bf16.msra.mxu3 %v4444_v18  ;;  %v4469_v16 = vld [vmem:[%s5006_s7 + $0x1c0] sm:$0xff] }
 0xa04   : > { %v5387_v17 = vld [vmem:[%s5001_s6] sm:$0xff] }
 0xa05   : > { %v1531_v18 = vperm.slane %v5387_v17, 0 }
 0xa06   : > { %3075 = vmatpush.bf16.msrb.mxu0 %v4419_v19  ;;  %3088 = vmatpush.bf16.msrb.mxu1 %v4427_v20  ;;  %v1532_v19 = vperm.slane %v5387_v17, 1 }
 0xa07   : > { %3101 = vmatpush.bf16.msrb.mxu2 %v4435_v21  ;;  %3114 = vmatpush.bf16.msra.mxu3 %v4443_v22 }
 0xa0a   : > { %3076 = vmatpush.bf16.msrb.mxu0 %v4418_v23  ;;  %3089 = vmatpush.bf16.msrb.mxu1 %v4426_v24 }
 0xa0b   : > { %3102 = vmatpush.bf16.msrb.mxu2 %v4434_v25  ;;  %3115 = vmatpush.bf16.msra.mxu3 %v4442_v26  ;;  %v1533_v26 = vperm.slane %v5387_v17, 2 }
 0xa0e   : > { %3077 = vmatpush.bf16.msrb.mxu0 %v4417_v27  ;;  %3090 = vmatpush.bf16.msrb.mxu1 %v4425_v28  ;;  %v1534_v27 = vperm.slane %v5387_v17, 3  ;;  %v4484_v28 = vld [vmem:[%s5006_s7 + $0x238] sm:$0xff] }
 0xa0f   : > { %3103 = vmatpush.bf16.msrb.mxu2 %v4433_v30  ;;  %3116 = vmatpush.bf16.msra.mxu3 %v4441_v31  ;;  %v4492_v30 = vld [vmem:[%s5006_s7 + $0x278] sm:$0xff] }
 0xa10   : > { %3834 = vmatmul.msk.bf16.vlgmr.msra.gmra.mxu0 %vm803_vm1, %v5248_v40  ;;  %3835 = vmatmul.msk.bf16.vlgmr.msra.gmra.mxu1 %vm803_vm1, %v5248_v40 }
 0xa11   : > { %3836 = vmatmul.msk.bf16.vlgmr.msra.gmra.mxu2 %vm803_vm1, %v5248_v40  ;;  %3837 = vmatmul.msk.bf16.vlgmr.msrb.gmra.mxu3 %vm803_vm1, %v5248_v40  ;;  %v4422_v40 = vld [vmem:[%s5006_s7 + $0x48] sm:$0xff] }
 0xa12   : > { %3078 = vmatpush.bf16.msrb.mxu0 %v4416_v32  ;;  %3091 = vmatpush.bf16.msrb.mxu1 %v4424_v33 }
 0xa13   : > { %3104 = vmatpush.bf16.msrb.mxu2 %v4432_v1  ;;  %3117 = vmatpush.bf16.msra.mxu3 %v4440_v35 }
 0xa16   : > { %3079 = vmatpush.bf16.msrb.mxu0 %v4415_v36  ;;  %3092 = vmatpush.bf16.msrb.mxu1 %v4423_v37 }
 0xa17   : > { %3105 = vmatpush.bf16.msrb.mxu2 %v4431_v38  ;;  %3118 = vmatpush.bf16.msra.mxu3 %v4439_v39  ;;  %v4483_v39 = vld [vmem:[%s5006_s7 + $0x230] sm:$0xff] }
 0xa1a   : > { %3080 = vmatpush.bf16.msrb.mxu0 %v4414_v42  ;;  %3093 = vmatpush.bf16.msrb.mxu1 %v4422_v40  ;;  %v4491_v42 = vld [vmem:[%s5006_s7 + $0x270] sm:$0xff] }
 0xa1b   : > { %3106 = vmatpush.bf16.msrb.mxu2 %v4430_v43  ;;  %3119 = vmatpush.bf16.msra.mxu3 %v4438_v44  ;;  %v4500_v44 = vld [vmem:[%s5006_s7 + $0x2b8] sm:$0xff] }
 0xa1e   : > { %3081 = vmatpush.bf16.msrb.mxu0 %v4413_v45  ;;  %3094 = vmatpush.bf16.msrb.mxu1 %v4421_v46  ;;  %v4508_v45 = vld [vmem:[%s5006_s7 + $0x2f8] sm:$0xff] }
 0xa1f   : > { %3107 = vmatpush.bf16.msrb.mxu2 %v4429_v48  ;;  %3120 = vmatpush.bf16.msra.mxu3 %v4437_v49  ;;  %v4490_v48 = vld [vmem:[%s5006_s7 + $0x268] sm:$0xff]  ;;  %v1535_v49 = vperm.slane %v5387_v17, 4 }
 0xa22   : > { %3126 = vmatpush.bf16.msra.mxu0 %v4452_v41  ;;  %3139 = vmatpush.bf16.msra.mxu1 %v4460_v47  ;;  %v4482_v47 = vld [vmem:[%s5006_s7 + $0x228] sm:$0xff] }
 0xa23   : > { %3152 = vmatpush.bf16.msra.mxu2 %v4468_v50  ;;  %3165 = vmatpush.bf16.msrb.mxu3 %v4476_v51  ;;  %v1536_v50 = vperm.slane %v5387_v17, 5 }
 0xa26   : > { %3127 = vmatpush.bf16.msra.mxu0 %v4451_v52  ;;  %3140 = vmatpush.bf16.msra.mxu1 %v4459_v54  ;;  %v4499_v54 = vld [vmem:[%s5006_s7 + $0x2b0] sm:$0xff] }
 0xa27   : > { %3153 = vmatpush.bf16.msra.mxu2 %v4467_v55  ;;  %3166 = vmatpush.bf16.msrb.mxu3 %v4475_v56  ;;  %v4507_v55 = vld [vmem:[%s5006_s7 + $0x2f0] sm:$0xff] }
 0xa2a   : > { %3128 = vmatpush.bf16.msra.mxu0 %v4450_v57  ;;  %3141 = vmatpush.bf16.msra.mxu1 %v4458_v59  ;;  %v4481_v59 = vld [vmem:[%s5006_s7 + $0x220] sm:$0xff] }
 0xa2b   : > { %3154 = vmatpush.bf16.msra.mxu2 %v4466_v60  ;;  %3167 = vmatpush.bf16.msrb.mxu3 %v4474_v61  ;;  %v4489_v60 = vld [vmem:[%s5006_s7 + $0x260] sm:$0xff] }
 0xa2e   : > { %3129 = vmatpush.bf16.msra.mxu0 %v4449_v62  ;;  %3142 = vmatpush.bf16.msra.mxu1 %v4457_v0 }
 0xa2f   : > { %3155 = vmatpush.bf16.msra.mxu2 %v4465_v2  ;;  %3168 = vmatpush.bf16.msrb.mxu3 %v4473_v53  ;;  %v4498_v53 = vld [vmem:[%s5006_s7 + $0x2a8] sm:$0xff] }
 0xa32   : > { %3130 = vmatpush.bf16.msra.mxu0 %v4448_v3  ;;  %3143 = vmatpush.bf16.msra.mxu1 %v4456_v63  ;;  %v4506_v3 = vld [vmem:[%s5006_s7 + $0x2e8] sm:$0xff]  ;;  %v1537_v63 = vperm.slane %v5387_v17, 6 }
 0xa33   : > { %3156 = vmatpush.bf16.msra.mxu2 %v4464_v6  ;;  %3169 = vmatpush.bf16.msrb.mxu3 %v4472_v7  ;;  %v4480_v7 = vld [vmem:[%s5006_s7 + $0x218] sm:$0xff] }
 0xa36   : > { %3131 = vmatpush.bf16.msra.mxu0 %v4447_v4  ;;  %3144 = vmatpush.bf16.msra.mxu1 %v4455_v5  ;;  %v1538_v4 = vperm.slane %v5387_v17, 7  ;;  %v4487_v17 = vld [vmem:[%s5006_s7 + $0x250] sm:$0xff] }
 0xa37   : > { %3157 = vmatpush.bf16.msra.mxu2 %v4463_v58  ;;  %3170 = vmatpush.bf16.msrb.mxu3 %v4471_v11  ;;  %v4497_v11 = vld [vmem:[%s5006_s7 + $0x2a0] sm:$0xff] }
 0xa3a   : > { %3132 = vmatpush.bf16.msra.mxu0 %v4446_v8  ;;  %3145 = vmatpush.bf16.msra.mxu1 %v4454_v10  ;;  %v4488_v8 = vld [vmem:[%s5006_s7 + $0x258] sm:$0xff] }
 0xa3b   : > { %3158 = vmatpush.bf16.msra.mxu2 %v4462_v34  ;;  %3171 = vmatpush.bf16.msrb.mxu3 %v4470_v14 }
 0xa3e   : > { %3133 = vmatpush.bf16.msra.mxu0 %v4445_v12  ;;  %3146 = vmatpush.bf16.msra.mxu1 %v4453_v13  ;;  %v4505_v12 = vld [vmem:[%s5006_s7 + $0x2e0] sm:$0xff] }
 0xa3f   : > { %3159 = vmatpush.bf16.msra.mxu2 %v4461_v15  ;;  %3172 = vmatpush.bf16.msrb.mxu3 %v4469_v16  ;;  %v4479_v16 = vld [vmem:[%s5006_s7 + $0x210] sm:$0xff] }
 0xa5d   : > { %v1815_v20 = vpop.f32.mrf.mxu0  ;;  %v1828_v21 = vpop.f32.mrf.mxu1 }
 0xa5e   : > { %v1816_v22 = vadd.f32 %v1815_v20, %v1531_v18  ;;  %v1829_v23 = vadd.f32 %v1828_v21, %v1532_v19  ;;  %v5418_v20 = vld [vmem:[%s5001_s6 + $0x8] sm:$0xff]  ;;  %v4496_v21 = vld [vmem:[%s5006_s7 + $0x298] sm:$0xff] }
 0xa60   : > { %v2014_v24 = vmax.f32 %v1816_v22, 0.0  ;;  %v2015_v25 = vmax.f32 %v1829_v23, 0.0  ;;  %v4504_v22 = vld [vmem:[%s5006_s7 + $0x2d8] sm:$0xff] }
 0xa62   : > { %v2030_v31 = vpack.c.bf16 %v2014_v24, %v2014_v24  ;;  %v2031_v32 = vpack.c.bf16 %v2015_v25, %v2015_v25  ;;  %v4478_v25 = vld [vmem:[%s5006_s7 + $0x208] sm:$0xff] }
 0xa64   : > { %v1841_v33 = vpop.f32.mrf.mxu2  ;;  %v1854_v1 = vpop.f32.mrf.mxu3  ;;  %3082 = vmatmul.bf16.vlgmr.msrb.gmra.mxu0 %v2030_v31  ;;  %3095 = vmatmul.bf16.vlgmr.msrb.gmra.mxu1 %v2031_v32  ;;  %v4495_v32 = vld [vmem:[%s5006_s7 + $0x290] sm:$0xff] }
 0xa65   : > { %v1842_v35 = vadd.f32 %v1841_v33, %v1533_v26  ;;  %v1855_v36 = vadd.f32 %v1854_v1, %v1534_v27  ;;  %3178 = vmatpush.bf16.msrb.mxu0 %v4484_v28  ;;  %3191 = vmatpush.bf16.msrb.mxu1 %v4492_v30  ;;  %v1817_v37 = vpop.f32.mrf.mxu0  ;;  %v1830_v38 = vpop.f32.mrf.mxu1  ;;  %v4486_v26 = vld [vmem:[%s5006_s7 + $0x248] sm:$0xff]  ;;  %v1539_v27 = vperm.slane %v5418_v20, 0  ;;  %v1540_v28 = vperm.slane %v5418_v20, 1  ;;  %v4503_v33 = vld [vmem:[%s5006_s7 + $0x2d0] sm:$0xff] }
 0xa66   : > { %v4477_v38 = vld [vmem:[%s5006_s7 + $0x200] sm:$0xff] }
 0xa67   : > { %v2016_v40 = vmax.f32 %v1842_v35, 0.0  ;;  %v2017_v43 = vmax.f32 %v1855_v36, 0.0 }
 0xa69   : > { %v2032_v46 = vpack.c.bf16 %v2016_v40, %v2016_v40  ;;  %v2033_v41 = vpack.c.bf16 %v2017_v43, %v2017_v43  ;;  %3179 = vmatpush.bf16.msrb.mxu0 %v4483_v39  ;;  %3192 = vmatpush.bf16.msrb.mxu1 %v4491_v42  ;;  %v4485_v39 = vld [vmem:[%s5006_s7 + $0x240] sm:$0xff]  ;;  %v4516_v42 = vld [vmem:[%s5006_s7 + $0x338] sm:$0xff] }
 0xa6a   : > { %v4524_v40 = vld [vmem:[%s5006_s7 + $0x378] sm:$0xff] }
 0xa6b   : > { %3108 = vmatmul.bf16.vlgmr.msrb.gmra.mxu2 %v2032_v46  ;;  %3121 = vmatmul.bf16.vlgmr.msra.gmra.mxu3 %v2033_v41  ;;  %v4502_v46 = vld [vmem:[%s5006_s7 + $0x2c8] sm:$0xff]  ;;  %v1541_v41 = vperm.slane %v5418_v20, 2 }
 0xa6c   : > { %3204 = vmatpush.bf16.msrb.mxu2 %v4500_v44  ;;  %3217 = vmatpush.bf16.msra.mxu3 %v4508_v45  ;;  %v1843_v51 = vpop.f32.mrf.mxu2  ;;  %v1856_v52 = vpop.f32.mrf.mxu3  ;;  %v4494_v45 = vld [vmem:[%s5006_s7 + $0x288] sm:$0xff] }
 0xa6d   : > { %3180 = vmatpush.bf16.msrb.mxu0 %v4482_v47  ;;  %3193 = vmatpush.bf16.msrb.mxu1 %v4490_v48  ;;  %v1867_v56 = vpop.f32.mrf.mxu0  ;;  %v1880_v57 = vpop.f32.mrf.mxu1  ;;  %v1542_v47 = vperm.slane %v5418_v20, 3  ;;  %v4523_v51 = vld [vmem:[%s5006_s7 + $0x370] sm:$0xff] }
 0xa6e   : > { %v1868_v61 = vadd.f32 %v1867_v56, %v1535_v49  ;;  %v1881_v62 = vadd.f32 %v1880_v57, %v1536_v50  ;;  %v4515_v50 = vld [vmem:[%s5006_s7 + $0x330] sm:$0xff]  ;;  %v4501_v56 = vld [vmem:[%s5006_s7 + $0x2c0] sm:$0xff] }
 0xa70   : > { %v2018_v0 = vmax.f32 %v1868_v61, 0.0  ;;  %v2019_v2 = vmax.f32 %v1881_v62, 0.0  ;;  %3205 = vmatpush.bf16.msrb.mxu2 %v4499_v54  ;;  %3218 = vmatpush.bf16.msra.mxu3 %v4507_v55  ;;  %v4493_v55 = vld [vmem:[%s5006_s7 + $0x280] sm:$0xff]  ;;  %v4532_v62 = vld [vmem:[%s5006_s7 + $0x3b8] sm:$0xff] }
 0xa71   : > { %3181 = vmatpush.bf16.msrb.mxu0 %v4481_v59  ;;  %3194 = vmatpush.bf16.msrb.mxu1 %v4489_v60 }
 0xa72   : > { %v2034_v5 = vpack.c.bf16 %v2018_v0, %v2018_v0  ;;  %v2035_v6 = vpack.c.bf16 %v2019_v2, %v2019_v2  ;;  %v4540_v0 = vld [vmem:[%s5006_s7 + $0x3f8] sm:$0xff] }
 0xa74   : > { %3206 = vmatpush.bf16.msrb.mxu2 %v4498_v53  ;;  %3219 = vmatpush.bf16.msra.mxu3 %v4506_v3  ;;  %v1893_v10 = vpop.f32.mrf.mxu2  ;;  %v1906_v58 = vpop.f32.mrf.mxu3  ;;  %v4514_v3 = vld [vmem:[%s5006_s7 + $0x328] sm:$0xff] }
 0xa75   : > { %v1894_v13 = vadd.f32 %v1893_v10, %v1537_v63  ;;  %v1907_v34 = vadd.f32 %v1906_v58, %v1538_v4  ;;  %3134 = vmatmul.bf16.vlgmr.msra.gmra.mxu0 %v2034_v5  ;;  %3147 = vmatmul.bf16.vlgmr.msra.gmra.mxu1 %v2035_v6  ;;  %v1869_v14 = vpop.f32.mrf.mxu0  ;;  %v1882_v15 = vpop.f32.mrf.mxu1  ;;  %v4522_v63 = vld [vmem:[%s5006_s7 + $0x368] sm:$0xff]  ;;  %v4531_v6 = vld [vmem:[%s5006_s7 + $0x3b0] sm:$0xff]  ;;  %v4521_v10 = vld [vmem:[%s5006_s7 + $0x360] sm:$0xff] }
 0xa76   : > { %3182 = vmatpush.bf16.msrb.mxu0 %v4480_v7  ;;  %3195 = vmatpush.bf16.msrb.mxu1 %v4488_v8  ;;  %v4539_v7 = vld [vmem:[%s5006_s7 + $0x3f0] sm:$0xff]  ;;  %v4513_v8 = vld [vmem:[%s5006_s7 + $0x320] sm:$0xff]  ;;  %v4538_v14 = vld [vmem:[%s5006_s7 + $0x3e8] sm:$0xff] }
 0xa77   : > { %v2020_v18 = vmax.f32 %v1894_v13, 0.0  ;;  %v2021_v19 = vmax.f32 %v1907_v34, 0.0  ;;  %v4530_v34 = vld [vmem:[%s5006_s7 + $0x3a8] sm:$0xff]  ;;  %v4512_v15 = vld [vmem:[%s5006_s7 + $0x318] sm:$0xff] }
 0xa78   : > { %3207 = vmatpush.bf16.msrb.mxu2 %v4497_v11  ;;  %3220 = vmatpush.bf16.msra.mxu3 %v4505_v12 }
 0xa79   : > { %v2036_v23 = vpack.c.bf16 %v2020_v18, %v2020_v18  ;;  %v2037_v24 = vpack.c.bf16 %v2021_v19, %v2021_v19  ;;  %v4537_v18 = vld [vmem:[%s5006_s7 + $0x3e0] sm:$0xff]  ;;  %v4511_v19 = vld [vmem:[%s5006_s7 + $0x310] sm:$0xff] }
 0xa7a   : > { %3183 = vmatpush.bf16.msrb.mxu0 %v4479_v16  ;;  %3196 = vmatpush.bf16.msrb.mxu1 %v4487_v17  ;;  %v4520_v16 = vld [vmem:[%s5006_s7 + $0x358] sm:$0xff]  ;;  %v4529_v17 = vld [vmem:[%s5006_s7 + $0x3a0] sm:$0xff] }
 0xa7b   : > { %3160 = vmatmul.bf16.vlgmr.msra.gmra.mxu2 %v2036_v23  ;;  %3173 = vmatmul.bf16.vlgmr.msrb.gmra.mxu3 %v2037_v24  ;;  %v1544_v23 = vperm.slane %v5418_v20, 5 }
 0xa7c   : > { %3208 = vmatpush.bf16.msrb.mxu2 %v4496_v21  ;;  %3221 = vmatpush.bf16.msra.mxu3 %v4504_v22  ;;  %v1895_v30 = vpop.f32.mrf.mxu2  ;;  %v1908_v31 = vpop.f32.mrf.mxu3  ;;  %v4519_v21 = vld [vmem:[%s5006_s7 + $0x350] sm:$0xff]  ;;  %v1543_v22 = vperm.slane %v5418_v20, 4 }
 0xa7d   : > { %v1919_v1 = vpop.f32.mrf.mxu0  ;;  %v1932_v35 = vpop.f32.mrf.mxu1  ;;  %v4536_v30 = vld [vmem:[%s5006_s7 + $0x3d8] sm:$0xff]  ;;  %v4510_v31 = vld [vmem:[%s5006_s7 + $0x308] sm:$0xff] }
 0xa7e   : > { %3184 = vmatpush.bf16.msrb.mxu0 %v4478_v25  ;;  %3197 = vmatpush.bf16.msrb.mxu1 %v4486_v26  ;;  %v1920_v36 = vadd.f32 %v1919_v1, %v1539_v27  ;;  %v1933_v37 = vadd.f32 %v1932_v35, %v1540_v28  ;;  %v4528_v28 = vld [vmem:[%s5006_s7 + $0x398] sm:$0xff]  ;;  %v4527_v35 = vld [vmem:[%s5006_s7 + $0x390] sm:$0xff] }
 0xa80   : > { %v2022_v43 = vmax.f32 %v1920_v36, 0.0  ;;  %v2023_v44 = vmax.f32 %v1933_v37, 0.0  ;;  %3209 = vmatpush.bf16.msrb.mxu2 %v4495_v32  ;;  %3222 = vmatpush.bf16.msra.mxu3 %v4503_v33  ;;  %v4518_v32 = vld [vmem:[%s5006_s7 + $0x348] sm:$0xff]  ;;  %v4535_v36 = vld [vmem:[%s5006_s7 + $0x3d0] sm:$0xff]  ;;  %v1545_v37 = vperm.slane %v5418_v20, 6 }
 0xa82   : > { %v2038_v48 = vpack.c.bf16 %v2022_v43, %v2022_v43  ;;  %v2039_v49 = vpack.c.bf16 %v2023_v44, %v2023_v44  ;;  %3185 = vmatpush.bf16.msrb.mxu0 %v4477_v38  ;;  %3198 = vmatpush.bf16.msrb.mxu1 %v4485_v39  ;;  %v1546_v38 = vperm.slane %v5418_v20, 7  ;;  %v4509_v39 = vld [vmem:[%s5006_s7 + $0x300] sm:$0xff] }
 0xa84   : > { %3210 = vmatpush.bf16.msrb.mxu2 %v4494_v45  ;;  %3223 = vmatpush.bf16.msra.mxu3 %v4502_v46  ;;  %v1945_v52 = vpop.f32.mrf.mxu2  ;;  %v1958_v54 = vpop.f32.mrf.mxu3  ;;  %v4526_v46 = vld [vmem:[%s5006_s7 + $0x388] sm:$0xff] }
 0xa85   : > { %v1946_v57 = vadd.f32 %v1945_v52, %v1541_v41  ;;  %v1959_v59 = vadd.f32 %v1958_v54, %v1542_v47  ;;  %3186 = vmatmul.bf16.vlgmr.msrb.gmra.mxu0 %v2038_v48  ;;  %3199 = vmatmul.bf16.vlgmr.msrb.gmra.mxu1 %v2039_v49  ;;  %v1921_v60 = vpop.f32.mrf.mxu0  ;;  %v1934_v61 = vpop.f32.mrf.mxu1  ;;  %v4534_v41 = vld [vmem:[%s5006_s7 + $0x3c8] sm:$0xff] }
 0xa86   : > { %3230 = vmatpush.bf16.msra.mxu0 %v4516_v42  ;;  %3243 = vmatpush.bf16.msra.mxu1 %v4524_v40  ;;  %v4517_v42 = vld [vmem:[%s5006_s7 + $0x340] sm:$0xff] }
 0xa87   : > { %v2024_v2 = vmax.f32 %v1946_v57, 0.0  ;;  %v2025_v53 = vmax.f32 %v1959_v59, 0.0 }
 0xa88   : > { %3211 = vmatpush.bf16.msrb.mxu2 %v4493_v55  ;;  %3224 = vmatpush.bf16.msra.mxu3 %v4501_v56 }
 0xa89   : > { %v2040_v4 = vpack.c.bf16 %v2024_v2, %v2024_v2  ;;  %v2041_v5 = vpack.c.bf16 %v2025_v53, %v2025_v53 }
 0xa8a   : > { %3231 = vmatpush.bf16.msra.mxu0 %v4515_v50  ;;  %3244 = vmatpush.bf16.msra.mxu1 %v4523_v51  ;;  %v4525_v50 = vld [vmem:[%s5006_s7 + $0x380] sm:$0xff] }
 0xa8b   : > { %3212 = vmatmul.bf16.vlgmr.msrb.gmra.mxu2 %v2040_v4  ;;  %3225 = vmatmul.bf16.vlgmr.msra.gmra.mxu3 %v2041_v5  ;;  %v4533_v51 = vld [vmem:[%s5006_s7 + $0x3c0] sm:$0xff] }
 0xa8c   : > { %3256 = vmatpush.bf16.msra.mxu2 %v4532_v62  ;;  %3269 = vmatpush.bf16.msrb.mxu3 %v4540_v0  ;;  %v1947_v58 = vpop.f32.mrf.mxu2  ;;  %v1960_v11 = vpop.f32.mrf.mxu3  ;;  %v4626_v4 = vld [vmem:[%s790_s10] ss:$0 sm:$0xff]  ;;  %s5625_s10 = sld [smem:[#allocation9_spill]] }
 0xa8d   : > { %v1971_v12 = vpop.f32.mrf.mxu0  ;;  %v1984_v13 = vpop.f32.mrf.mxu1 }
 0xa8e   : > { %3232 = vmatpush.bf16.msra.mxu0 %v4514_v3  ;;  %3245 = vmatpush.bf16.msra.mxu1 %v4522_v63  ;;  %v1972_v33 = vadd.f32 %v1971_v12, %v1543_v22  ;;  %v1985_v1 = vadd.f32 %v1984_v13, %v1544_v23 }
 0xa90   : > { %3257 = vmatpush.bf16.msra.mxu2 %v4531_v6  ;;  %3270 = vmatpush.bf16.msrb.mxu3 %v4539_v7  ;;  %v2026_v40 = vmax.f32 %v1972_v33, 0.0  ;;  %v2027_v43 = vmax.f32 %v1985_v1, 0.0 }
 0xa92   : > { %3233 = vmatpush.bf16.msra.mxu0 %v4513_v8  ;;  %3246 = vmatpush.bf16.msra.mxu1 %v4521_v10  ;;  %v2042_v49 = vpack.c.bf16 %v2026_v40, %v2026_v40  ;;  %v2043_v20 = vpack.c.bf16 %v2027_v43, %v2027_v43  ;;  %p4350_p1 = scmp.ne.s32.totalorder %s5625_s10, 1 }
 0xa93   : > { %s5626_s15 = sld [smem:[#allocation31_spill]] (!%p4350_p1) }
 0xa94   : > { %3258 = vmatpush.bf16.msra.mxu2 %v4530_v34  ;;  %3271 = vmatpush.bf16.msrb.mxu3 %v4538_v14  ;;  %v1997_v24 = vpop.f32.mrf.mxu2  ;;  %v2010_v25 = vpop.f32.mrf.mxu3  ;;  %s5627_s21 = sld [smem:[#allocation32_spill]] (!%p4350_p1) }
 0xa95   : > { %v1973_v26 = vpop.f32.mrf.mxu0  ;;  %v1986_v27 = vpop.f32.mrf.mxu1  ;;  %v1998_v47 = vadd.f32 %v1997_v24, %v1545_v37  ;;  %v2011_v48 = vadd.f32 %v2010_v25, %v1546_v38 }
 0xa96   : > { %3234 = vmatpush.bf16.msra.mxu0 %v4512_v15  ;;  %3247 = vmatpush.bf16.msra.mxu1 %v4520_v16 }
 0xa97   : > { %v2028_v52 = vmax.f32 %v1998_v47, 0.0  ;;  %v2029_v54 = vmax.f32 %v2011_v48, 0.0 }
 0xa98   : > { %3259 = vmatpush.bf16.msra.mxu2 %v4529_v17  ;;  %3272 = vmatpush.bf16.msrb.mxu3 %v4537_v18 }
 0xa99   : > { %v2044_v55 = vpack.c.bf16 %v2028_v52, %v2028_v52  ;;  %v2045_v56 = vpack.c.bf16 %v2029_v54, %v2029_v54 }
 0xa9a   : > { %3235 = vmatpush.bf16.msra.mxu0 %v4511_v19  ;;  %3248 = vmatpush.bf16.msra.mxu1 %v4519_v21 }
 0xa9c   : > { %3260 = vmatpush.bf16.msra.mxu2 %v4528_v28  ;;  %3273 = vmatpush.bf16.msrb.mxu3 %v4536_v30  ;;  %v1999_v44 = vpop.f32.mrf.mxu2  ;;  %v2012_v45 = vpop.f32.mrf.mxu3 }
 0xa9e   : > { %3236 = vmatpush.bf16.msra.mxu0 %v4510_v31  ;;  %3249 = vmatpush.bf16.msra.mxu1 %v4518_v32 }
 0xaa0   : > { %3261 = vmatpush.bf16.msra.mxu2 %v4527_v35  ;;  %3274 = vmatpush.bf16.msrb.mxu3 %v4535_v36 }
 0xaa2   : > { %3237 = vmatpush.bf16.msra.mxu0 %v4509_v39  ;;  %3250 = vmatpush.bf16.msra.mxu1 %v4517_v42 }
 0xaa4   : > { %3262 = vmatpush.bf16.msra.mxu2 %v4526_v46  ;;  %3275 = vmatpush.bf16.msrb.mxu3 %v4534_v41 }
 0xaa5   : > { %3238 = vmatmul.bf16.vlgmr.msra.gmra.mxu0 %v2042_v49  ;;  %3251 = vmatmul.bf16.vlgmr.msra.gmra.mxu1 %v2043_v20 }
 0xaa8   : > { %3263 = vmatpush.bf16.msra.mxu2 %v4525_v50  ;;  %3276 = vmatpush.bf16.msrb.mxu3 %v4533_v51 }
 0xaab   : > { %3264 = vmatmul.bf16.vlgmr.msra.gmra.mxu2 %v2044_v55  ;;  %3277 = vmatmul.bf16.vlgmr.msrb.gmra.mxu3 %v2045_v56 }
 0xae1   : > { %v3083_v57 = vpop.f32.mrf.mxu0  ;;  %v3096_v59 = vpop.f32.mrf.mxu1 }
 0xae2   : > { %v3084_v7 = vadd.f32 %v4626_v4, %v3083_v57 }
 0xae4   : > { %v3097_v58 = vadd.f32 %v3096_v59, %v3084_v7 }
 0xae9   : > { %v3085_v60 = vpop.f32.mrf.mxu0  ;;  %v3098_v61 = vpop.f32.mrf.mxu1 }
 0xaee   : > { %v3109_v62 = vpop.f32.mrf.mxu2  ;;  %v3122_v0 = vpop.f32.mrf.mxu3 }
 0xaef   : > { %v3110_v13 = vadd.f32 %v3109_v62, %v3097_v58 }
 0xaf1   : > { %v3123_v15 = vadd.f32 %v3122_v0, %v3110_v13 }
 0xaf2   : > { %v3135_v2 = vpop.f32.mrf.mxu0  ;;  %v3148_v53 = vpop.f32.mrf.mxu1 }
 0xaf3   : > { %v3136_v18 = vadd.f32 %v3135_v2, %v3123_v15 }
 0xaf5   : > { %v3149_v22 = vadd.f32 %v3148_v53, %v3136_v18 }
 0xaf6   : > { %v3111_v3 = vpop.f32.mrf.mxu2  ;;  %v3124_v63 = vpop.f32.mrf.mxu3 }
 0xafa   : > { %v3137_v5 = vpop.f32.mrf.mxu0  ;;  %v3150_v6 = vpop.f32.mrf.mxu1 }
 0xafe   : > { %v3161_v8 = vpop.f32.mrf.mxu2  ;;  %v3174_v10 = vpop.f32.mrf.mxu3 }
 0xaff   : > { %v3162_v23 = vadd.f32 %v3161_v8, %v3149_v22 }
 0xb01   : > { %v3175_v24 = vadd.f32 %v3174_v10, %v3162_v23 }
 0xb02   : > { %v3187_v11 = vpop.f32.mrf.mxu0  ;;  %v3200_v12 = vpop.f32.mrf.mxu1 }
 0xb03   : > { %v3188_v27 = vadd.f32 %v3187_v11, %v3175_v24 }
 0xb05   : > { %v3201_v28 = vadd.f32 %v3200_v12, %v3188_v27 }
 0xb06   : > { %v3163_v34 = vpop.f32.mrf.mxu2  ;;  %v3176_v14 = vpop.f32.mrf.mxu3 }
 0xb0a   : > { %v3189_v16 = vpop.f32.mrf.mxu0  ;;  %v3202_v17 = vpop.f32.mrf.mxu1 }
 0xb0e   : > { %v3213_v19 = vpop.f32.mrf.mxu2  ;;  %v3226_v21 = vpop.f32.mrf.mxu3 }
 0xb0f   : > { %v3214_v32 = vadd.f32 %v3213_v19, %v3201_v28 }
 0xb11   : > { %v3227_v33 = vadd.f32 %v3226_v21, %v3214_v32 }
 0xb16   : > { %v3215_v25 = vpop.f32.mrf.mxu2  ;;  %v3228_v26 = vpop.f32.mrf.mxu3 }
 0xb22   : > { %v3239_v30 = vpop.f32.mrf.mxu0  ;;  %v3252_v31 = vpop.f32.mrf.mxu1 }
 0xb23   : > { %v3240_v1 = vadd.f32 %v3239_v30, %v3227_v33 }
 0xb25   : > { %v3253_v37 = vadd.f32 %v3252_v31, %v3240_v1 }
 0xb2a   : > { %v3241_v35 = vpop.f32.mrf.mxu0  ;;  %v3254_v36 = vpop.f32.mrf.mxu1 }
 0xb2e   : > { %v3265_v38 = vpop.f32.mrf.mxu2  ;;  %v3278_v39 = vpop.f32.mrf.mxu3 }
 0xb2f   : > { %v3266_v42 = vadd.f32 %v3265_v38, %v3253_v37 }
 0xb31   : > { %v3279_v40 = vadd.f32 %v3278_v39, %v3266_v42 }
 0xb32   : > { %3287 = sbr.rel (%p4350_p1) target bundleno = 3150 (0xc4e), region = 96 }
 0xb33   : > { %v3282_v43 = vadd.f32 %v3279_v40, %v5161_v29 }
 0xb35   : > { %3283 = vst.msk [vmem:[#allocation2] sm:$0xff] %vm803_vm1, %v3282_v43 }
 0xb36   : > { %v3267_v44 = vpop.f32.mrf.mxu2  ;;  %v3280_v45 = vpop.f32.mrf.mxu3 }
 0xb37   : > { %v3290_v46 = vsel %vm803_vm1, %v3282_v43, 0.0  ;;  %v4661_v0 = vld [vmem:[%s5626_s15] ss:$0 sm:$0xff] }
 0xb38   : > { %3291 = vadd.xlane.f32.xlu0 %v3290_v46  ;;  %v4662_v3 = vld [vmem:[%s5627_s21] ss:$0 sm:$0xff] }
 0xbab   : > { %v3292_v41 = vpop.xlane.xlu0 %3291 }
 0xbac   : > { %v3293_v47 = vmul.f32 %v3292_v41, %v5018_v9 }
 0xbae   : > { %v3294_v48 = vsub.f32 %v3282_v43, %v3293_v47 }
 0xbb0   : > { %v3295_v49 = vmul.f32 %v3294_v48, %v3294_v48 }
 0xbb2   : > { %v3296_v20 = vsel %vm803_vm1, %v3295_v49, 0.0 }
 0xbb3   : > { %3297 = vadd.xlane.f32.xlu0 %v3296_v20 }
 0xc26   : > { %v3298_v50 = vpop.xlane.xlu0 %3297 }
 0xc27   : > { %v3299_v29 = vmul.f32 0.021276595, %v3298_v50 }
 0xc29   : > { %4663 = vrsqrt.f32 %v3299_v29  ;;  %vm3307_vm9 = vcmp.eq.f32.partialorder %v3299_v29, inf  ;;  %v3310_v60 = vand.u32 2147483648, %v3299_v29  ;;  %vm3309_vm10 = vcmp.eq.f32.partialorder %v3299_v29, 0.0 }
 0xc2f   : > { %v4664_v51 = vpop.eup %4663 }
 0xc30   : > { %v3301_v52 = vmul.f32 %v4664_v51, %v3299_v29 }
 0xc32   : > { %v3302_v54 = vmul.f32 %v4664_v51, %v3301_v52 }
 0xc34   : > { %v3303_v55 = vmul.f32 0.5, %v3302_v54 }
 0xc36   : > { %v3304_v56 = vsub.f32 1.5, %v3303_v55 }
 0xc38   : > { %v3305_v57 = vmul.f32 %v4664_v51, %v3304_v56 }
 0xc3a   : > { %v3306_v59 = vmul.f32 %v3305_v57, %v3299_v29 }
 0xc3c   : > { %v3308_v61 = vsel %vm3307_vm9, %v3299_v29, %v3306_v59 }
 0xc3d   : > { %v3311_v9 = vsel %vm3309_vm10, %v3310_v60, %v3308_v61 }
 0xc3e   : > { %v3312_v62 = vadd.f32 1e-06, %v3311_v9 }
 0xc40   : > { %4665 = vrcp.f32 %v3312_v62 }
 0xc46   : > { %v4666_v2 = vpop.eup %4665 }
 0xc47   : > { %v3314_v53 = vmul.f32 %v4666_v2, %v3294_v48 }
 0xc49   : > { %v3318_v63 = vmul.f32 %v4661_v0, %v3314_v53 }
 0xc4b   : > { %v3322_v4 = vadd.f32 %v4662_v3, %v3318_v63 }
 0xc4d   : > { %3323 = vst.msk [vmem:[%s731_s9] sm:$0xff] %vm803_vm1, %v3322_v4 }
 0xc4e PF: > { %s5628_s18 = sld [smem:[#allocation10_spill]]  ;;  %s3337_s24 = sshll.u32 %s731_s9, 4  ;;  %s3338_s24 = int_to_ptr.vmem [resolvable:$true] %s3337_s24 }
 0xc4f   : > { %s5629_s1 = sld [smem:[#allocation7_spill]] }
 0xc50   : > { %s5631_s14 = sld [smem:[#allocation33_spill]] }
 0xc54   : > { %s4352_s16 = sshll.u32 %s5628_s18, 3 }
 0xc55   : > { %s5632_s5 = sand.u32 1, %s5629_s1  }
 0xc56   : > { %s3335_s13 = scalar_lea.hbm %s5631_s14, %s4352_s16  ;;  %s3325_s8 = scalar_lea.sflag [#allocation4], %s5632_s5 }
 0xc57   : > { %s3339_s19 = sshll.u32 %s3335_s13, 4  ;;  %s4687_s4 = scalar_lea.hbm %s5631_s14, 16  ;;  %s3340_s19 = int_to_ptr.hbm [resolvable:$true] %s3339_s19 }
 0xc58   : > { %s4681_s17 = sshra.s32 %s3340_s19, 4  ;;  %s4682_s17 = int_to_ptr.hbm [resolvable:$true] %s4681_s17 }
 0xc59   : > { %s4683_s27 = scalar_lea.hbm %s4682_s17, 8  ;;  %p4688_p6 = scmp.lt.s32.totalorder %s4682_s17, %s5631_s14 }
 0xc5a   : > { %p4684_p2 = scmp.ne.s32.totalorder %s4682_s17, %s4683_s27  ;;  %p4689_p7 = scmp.lt.s32.totalorder %s4687_s4, %s4683_s27 }
 0xc5c   : > { %p4685_p4 = pnand %p4684_p2, %p4908_p3  ;;  %p4690_p8 = por %p4689_p7, %p4688_p6 }
 0xc5e   : > { %p4686_p5 = pneg %p4685_p4 }
 0xc60   : > { %p4691_p10 = pnand %p4690_p8, %p4686_p5 }
 0xc62   : > { %4694 = shalt.err (!%p4691_p10)
}
 0xc63   : > { %4543 = dma.vmem_to_hbm [thread:$0]  (%p4908_p3), %s3338_s24, 128, %s3340_s19, %s3325_s8  }
 0xc64 PF: > { %s5633_s9 = sld [smem:[#allocation13_spill]] }
 0xc65   : > { %s5634_s29 = sld [smem:[#allocation6_spill]] }
 0xc6a   : > { %p4549_p11 = scmp.ge.s32.totalorder %s5633_s9, 2 }
 0xc6b   : > { %s3351_s23 = sand.u32 1, %s5634_s29  }
 0xc6c   : > { %p4546_p12 = pnand %p4549_p11, %p4918_p9  ;;  %s3352_s25 = scalar_lea.sflag [#allocation4], %s3351_s23 }
 0xc6e   : > { %p4547_p13 = pneg %p4546_p12 }
 0xc70   : > { %4728 = dma.done.wait (%p4547_p13), %s3352_s25, 128  }
 0xc71   : > { %4730 = vsyncadd (%p4547_p13), %s3352_s25, 4294967168  ;;  %s30_s30 = sadd.s32 1, %s5633_s9   ;;  %s5636_s24 = sld [smem:[#allocation7_spill]] }
 0xc72   : > { %p27_p0 = scmp.ge.s32.totalorder %s30_s30, 6   ;;  %s5637_s25 = sld [smem:[#allocation8_spill]] }
 0xc73   : > { %s5638_s26 = sld [smem:[#allocation18_spill]] }
 0xc74   : > { %s5639_s27 = sld [smem:[#allocation11_spill]]  ;;  %29 = sbr.rel (!%p27_p0) target bundleno = 21 (0x15), region = 173 }
 0xc75   : > { %s5640_s28 = sld [smem:[#allocation12_spill]] }
 0xc76   : > { %s5641_s29 = sld [smem:[#allocation14_spill]] }
 0xc77   : > { %s5642_s0 = sld [smem:[#allocation16_spill]] }
 0xc79   :  { %3358 = vsyncpa [#allocation4], 1 }
 0xc7a   :  { %3360 = vsyncpa [#allocation4 + $0x1], 1 }

</bundles_post_ra>
